<compile_context>
chip_gen: v7x
topology: tpu7x:2x2x1
jax: 0.10.0
libtpu: 0.0.40
codegen_flags: <defaults>
</compile_context>

<pallas_src>
import jax
import jax.numpy as jnp
from jax import lax
from jax.experimental import pallas as pl
from jax.experimental.pallas import tpu as pltpu

I_DIM = 10        # LSTM input feature size (fixed by the PyTorch module)
H_DIM = 64        # LSTM hidden size
NEG_SLOPE = 0.01  # nn.LeakyReLU default negative slope


def _leaky_relu(x):
    return jnp.where(x > 0, x, NEG_SLOPE * x)


# ----------------------------------------------------------------------------
# Kernel: single program, whole problem resident in VMEM.
# ----------------------------------------------------------------------------
def tte_kernel(
    x_ref,                        # (T*Bp, I)        time-major flattened input
    wih1_ref, b1_ref,             # (I, 4H), (1, 4H) layer-1 input weights / fused bias
    whh1_ref,                     # (H, 4H)          layer-1 recurrent weights
    wih2_ref, whh2_ref, b2_ref,   # (H, 4H), (H, 4H), (1, 4H)  layer-2 weights / fused bias
    wr1_ref, br1_ref,             # (H, H), (1, H)   res Linear #1 (pre-transposed)
    wr2_ref, br2_ref,             # (H, H), (1, H)   res Linear #2 (pre-transposed)
    wf_ref, bf_ref,               # (1, H), (1, 1)   fc Linear as a row vector
    o_ref,                        # (Bp, 1)          output
    xproj_ref,                    # (T*Bp, 4H)       VMEM scratch: layer-1 input projection
):
    Bp = o_ref.shape[0]
    T = x_ref.shape[0] // Bp
    H = H_DIM

    # ---- Precompute layer-1 input projection for all timesteps (one matmul),
    # bias folded in, result parked in VMEM scratch (keeps it off the vreg file).
    xproj_ref[...] = (
        jnp.dot(x_ref[...], wih1_ref[...], preferred_element_type=jnp.float32)
        + b1_ref[...]
    )

    # Hoist the cheap (2-vreg) layer-2 bias broadcast out of the unrolled loop.
    # The weight matrices are intentionally NOT hoisted: re-read per matmul.
    b2 = jnp.broadcast_to(b2_ref[...], (Bp, 4 * H))

    def gates_to_hc(gates, c):
        # Gate column order (f, i, o, g).
        sig = jax.nn.sigmoid(gates[:, : 3 * H])   # f, i, o in one EUP pass
        g_g = jnp.tanh(gates[:, 3 * H:])          # g in one EUP pass
        f_g = sig[:, :H]
        i_g = sig[:, H: 2 * H]
        o_g = sig[:, 2 * H: 3 * H]
        c_new = f_g * c + i_g * g_g
        h_new = o_g * jnp.tanh(c_new)
        return h_new, c_new

    def xp(t):  # row block [t*Bp, (t+1)*Bp) of the precomputed projection
        return xproj_ref[pl.ds(t * Bp, Bp), :]

    def cell1(t, h1, c1):
        gates = xp(t) + jnp.dot(h1, whh1_ref[...],
                                preferred_element_type=jnp.float32)
        return gates_to_hc(gates, c1)

    def cell2(h1, h2, c2):
        gates = (jnp.dot(h1, wih2_ref[...], preferred_element_type=jnp.float32)
                 + jnp.dot(h2, whh2_ref[...], preferred_element_type=jnp.float32)
                 + b2)
        return gates_to_hc(gates, c2)

    zeros = jnp.zeros((Bp, H), jnp.float32)

    # ---- Skewed recurrence --------------------------------------------------
    # Prologue: layer-1 step 0 (zero initial state -> the h@Whh matmul and the
    # f*c term vanish, so it is just the precomputed gates).
    h1, c1 = gates_to_hc(xp(0), zeros)

    # Steady state: iteration t runs layer-2 step t-1 and layer-1 step t; both
    # depend only on the previous-iteration carry, so they interleave.
    def step(t, carry):
        h1, c1, h2, c2 = carry
        h2n, c2n = cell2(h1, h2, c2)   # layer-2 step t-1
        h1n, c1n = cell1(t, h1, c1)    # layer-1 step t
        return h1n, c1n, h2n, c2n

    # TODO(synk): for long sequences, bound the unroll (2-4) and add a T-chunk
    # grid axis ("arbitrary") with h/c carried in VMEM scratch so input DMA
    # overlaps the recurrence instead of keeping all of x resident.
    h1, c1, h2, c2 = lax.fori_loop(1, T, step, (h1, c1, zeros, zeros),
                                   unroll=True)

    # Epilogue: layer-2 step T-1 -> last-timestep hidden state of layer 2.
    h2, _ = cell2(h1, h2, c2)

    # ---- Residual MLP + final projection ------------------------------------
    r_out = h2                                                    # out[:, -1, :]
    y = _leaky_relu(jnp.dot(r_out, wr1_ref[...],
                            preferred_element_type=jnp.float32) + br1_ref[...])
    y = _leaky_relu(jnp.dot(y, wr2_ref[...],
                            preferred_element_type=jnp.float32) + br2_ref[...])
    z = y + r_out
    # Final (64 -> 1) projection as a VPU lane reduction (avoids an N=1 MXU pass).
    out = _leaky_relu(jnp.sum(z * wf_ref[...], axis=-1, keepdims=True)
                      + bf_ref[...])
    o_ref[...] = out.astype(o_ref.dtype)


# ----------------------------------------------------------------------------
# Wrapper
# ----------------------------------------------------------------------------
@jax.jit
def tte_forward(x, kp):
    """x: (B, T, I_DIM) float32. Returns (B, 1) float32."""
    B, T, I = x.shape
    assert I == I_DIM
    Bp = max(8, -(-B // 8) * 8)                  # pad batch to a full sublane group

    x_tbi = jnp.transpose(x, (1, 0, 2))          # (T, B, I) time-major
    x_pad = jnp.pad(x_tbi, ((0, 0), (0, Bp - B), (0, 0)))
    x_flat = x_pad.reshape(T * Bp, I_DIM)        # flattened outside the kernel

    vmem = pl.BlockSpec(memory_space=pltpu.MemorySpace.VMEM)

    # TODO(synk): for large B on v7x, add a leading "parallel" batch grid axis
    # so both TensorCores run independent batch slices of the recurrence.
    # TODO(synk): optionally cast matmul operands to bf16 (f32 accumulate) and,
    # on v5e, hold the recurrent weights resident in the MXU via
    # matmul_push_rhs/acc_lhs/pop once accuracy requirements allow.
    out = pl.pallas_call(
        tte_kernel,
        out_shape=jax.ShapeDtypeStruct((Bp, 1), jnp.float32),
        in_specs=[vmem] * 13,
        out_specs=vmem,
        scratch_shapes=[pltpu.VMEM((T * Bp, 4 * H_DIM), jnp.float32)],
    )(
        x_flat,
        kp["wih1"], kp["b1"], kp["whh1"],
        kp["wih2"], kp["whh2"], kp["b2"],
        kp["wr1"], kp["br1"],
        kp["wr2"], kp["br2"],
        kp["wf"], kp["bf"],
    )
    return out[:B]


# ----------------------------------------------------------------------------
# Parameter construction (PyTorch layout) and kernel-layout preparation.
# ----------------------------------------------------------------------------
def init_pt_params(key):
    """Deterministic synthetic parameters in the PyTorch module's layout."""
    H, I = H_DIM, I_DIM
    ks = jax.random.split(key, 14)
    u = lambda k, shape, s=0.1: jax.random.uniform(
        k, shape, jnp.float32, minval=-s, maxval=s)
    return {
        # LSTM layer 1 (gate row order i, f, g, o as in PyTorch)
        "w_ih1": u(ks[0], (4 * H, I)), "w_hh1": u(ks[1], (4 * H, H)),
        "b_ih1": u(ks[2], (4 * H,)),   "b_hh1": u(ks[3], (4 * H,)),
        # LSTM layer 2
        "w_ih2": u(ks[4], (4 * H, H)), "w_hh2": u(ks[5], (4 * H, H)),
        "b_ih2": u(ks[6], (4 * H,)),   "b_hh2": u(ks[7], (4 * H,)),
        # res: Linear(64,64) x2
        "w_r1": u(ks[8], (H, H)),  "b_r1": u(ks[9], (H,)),
        "w_r2": u(ks[10], (H, H)), "b_r2": u(ks[11], (H,)),
        # fc: Linear(64,1)
        "w_f": u(ks[12], (1, H)),  "b_f": u(ks[13], (1,)),
    }


def _reorder_gates(a):
    """Reorder gate columns (i, f, g, o) -> (f, i, o, g) along the last axis."""
    H = H_DIM
    i, f, g, o = a[..., :H], a[..., H:2 * H], a[..., 2 * H:3 * H], a[..., 3 * H:]
    return jnp.concatenate([f, i, o, g], axis=-1)


def prepare_kernel_params(pt):
    """Build transposed / gate-reordered / bias-fused parameters for the kernel."""
    H = H_DIM
    return {
        "wih1": _reorder_gates(pt["w_ih1"].T),                          # (10, 4H)
        "whh1": _reorder_gates(pt["w_hh1"].T),                          # (64, 4H)
        "b1": _reorder_gates((pt["b_ih1"] + pt["b_hh1"]).reshape(1, 4 * H)),
        "wih2": _reorder_gates(pt["w_ih2"].T),                          # (64, 4H)
        "whh2": _reorder_gates(pt["w_hh2"].T),                          # (64, 4H)
        "b2": _reorder_gates((pt["b_ih2"] + pt["b_hh2"]).reshape(1, 4 * H)),
        "wr1": pt["w_r1"].T, "br1": pt["b_r1"].reshape(1, H),
        "wr2": pt["w_r2"].T, "br2": pt["b_r2"].reshape(1, H),
        "wf": pt["w_f"].reshape(1, H), "bf": pt["b_f"].reshape(1, 1),
    }


# ----------------------------------------------------------------------------
# Pure-JAX reference (PyTorch semantics) for a correctness check.
# ----------------------------------------------------------------------------
def reference_forward(x, pt):
    H = H_DIM
    B, T, _ = x.shape

    def cell(x_t, h, c, w_ih, w_hh, b_ih, b_hh):
        gates = x_t @ w_ih.T + h @ w_hh.T + b_ih + b_hh
        i = jax.nn.sigmoid(gates[:, :H])
        f = jax.nn.sigmoid(gates[:, H:2 * H])
        g = jnp.tanh(gates[:, 2 * H:3 * H])
        o = jax.nn.sigmoid(gates[:, 3 * H:])
        c_new = f * c + i * g
        return o * jnp.tanh(c_new), c_new

    h1 = c1 = h2 = c2 = jnp.zeros((B, H), jnp.float32)
    for t in range(T):
        h1, c1 = cell(x[:, t], h1, c1, pt["w_ih1"], pt["w_hh1"],
                      pt["b_ih1"], pt["b_hh1"])
        h2, c2 = cell(h1, h2, c2, pt["w_ih2"], pt["w_hh2"],
                      pt["b_ih2"], pt["b_hh2"])
    r = h2
    y = _leaky_relu(r @ pt["w_r1"].T + pt["b_r1"])
    y = _leaky_relu(y @ pt["w_r2"].T + pt["b_r2"])
    z = y + r
    return _leaky_relu(z @ pt["w_f"].T + pt["b_f"])


if __name__ == "__main__":
    key = jax.random.PRNGKey(0)
    k_x, k_p = jax.random.split(key)

    B, T = 2, 8  # small shapes: batch=2, seq=8, feature=10 (fixed by module)
    x = jax.random.normal(k_x, (B, T, I_DIM), dtype=jnp.float32)
    pt_params = init_pt_params(k_p)
    kernel_params = prepare_kernel_params(pt_params)

    out = jax.block_until_ready(tte_forward(x, kernel_params))
    assert out.shape == (B, 1), out.shape

    ref = reference_forward(x, pt_params)
    assert jnp.allclose(out, ref, rtol=1e-3, atol=1e-3), (out, ref)

    print("KERNEL_OK")
</pallas_src>

<mosaic_0001>
module attributes {stable_mosaic.version = 11 : i64} {
  func.func @tte_kernel(%arg0: memref<64x10xf32, #tpu.memory_space<vmem>>, %arg1: memref<10x256xf32, #tpu.memory_space<vmem>>, %arg2: memref<1x256xf32, #tpu.memory_space<vmem>>, %arg3: memref<64x256xf32, #tpu.memory_space<vmem>>, %arg4: memref<64x256xf32, #tpu.memory_space<vmem>>, %arg5: memref<64x256xf32, #tpu.memory_space<vmem>>, %arg6: memref<1x256xf32, #tpu.memory_space<vmem>>, %arg7: memref<64x64xf32, #tpu.memory_space<vmem>>, %arg8: memref<1x64xf32, #tpu.memory_space<vmem>>, %arg9: memref<64x64xf32, #tpu.memory_space<vmem>>, %arg10: memref<1x64xf32, #tpu.memory_space<vmem>>, %arg11: memref<1x64xf32, #tpu.memory_space<vmem>>, %arg12: memref<1x1xf32, #tpu.memory_space<vmem>>, %arg13: memref<8x1xf32, #tpu.memory_space<vmem>>, %arg14: memref<64x256xf32, #tpu.memory_space<vmem>>) attributes {dimension_semantics = [], scalar_prefetch = 0 : i64, scratch_operands = 1 : i64, tpu.core_type = #tpu.core_type<tc>} {
    %c0 = arith.constant 0 : index
    %c0_0 = arith.constant 0 : index
    %0 = vector.load %arg0[%c0, %c0_0] : memref<64x10xf32, #tpu.memory_space<vmem>>, vector<64x10xf32>
    %c0_1 = arith.constant 0 : index
    %c0_2 = arith.constant 0 : index
    %1 = vector.load %arg1[%c0_1, %c0_2] : memref<10x256xf32, #tpu.memory_space<vmem>>, vector<10x256xf32>
    %cst = arith.constant dense<0.000000e+00> : vector<64x256xf32>
    %2 = tpu.matmul %0, %1, %cst {dimension_numbers = #tpu.dot_dimension_numbers<[1], [0], [0], [1], [0, 0, 1, 1], [], []>} : vector<64x10xf32>, vector<10x256xf32>, vector<64x256xf32> -> vector<64x256xf32>
    %c0_3 = arith.constant 0 : index
    %c0_4 = arith.constant 0 : index
    %3 = vector.load %arg2[%c0_3, %c0_4] : memref<1x256xf32, #tpu.memory_space<vmem>>, vector<1x256xf32>
    %4 = vector.broadcast %3 : vector<1x256xf32> to vector<64x256xf32>
    %5 = arith.addf %2, %4 : vector<64x256xf32>
    %c0_5 = arith.constant 0 : index
    %c0_6 = arith.constant 0 : index
    %6 = vector.load %arg14[%c0_5, %c0_6] : memref<64x256xf32, #tpu.memory_space<vmem>>, vector<64x256xf32>
    tpu.vector_store %arg14[%c0_5, %c0_6], %5 {strides = array<i32>} : memref<64x256xf32, #tpu.memory_space<vmem>>, vector<64x256xf32>,
    %c0_7 = arith.constant 0 : index
    %c0_8 = arith.constant 0 : index
    %7 = vector.load %arg6[%c0_7, %c0_8] : memref<1x256xf32, #tpu.memory_space<vmem>>, vector<1x256xf32>
    %8 = vector.shape_cast %7 : vector<1x256xf32> to vector<1x256xf32>
    %9 = vector.broadcast %8 : vector<1x256xf32> to vector<8x256xf32>
    %cst_9 = arith.constant 0.000000e+00 : f32
    %10 = vector.broadcast %cst_9 : f32 to vector<8x64xf32>
    %c0_10 = arith.constant 0 : index
    %c0_11 = arith.constant 0 : index
    %11 = vector.load %arg14[%c0_10, %c0_11] : memref<64x256xf32, #tpu.memory_space<vmem>>, vector<8x256xf32>
    %12 = vector.extract_strided_slice %11 {offsets = [0, 0], sizes = [8, 192], strides = [1, 1]} : vector<8x256xf32> to vector<8x192xf32>
    %13 = arith.negf %12 : vector<8x192xf32>
    %14 = math.exp %13 : vector<8x192xf32>
    %cst_12 = arith.constant 1.000000e+00 : f32
    %15 = vector.broadcast %cst_12 : f32 to vector<8x192xf32>
    %16 = arith.addf %15, %14 : vector<8x192xf32>
    %17 = arith.divf %15, %16 : vector<8x192xf32>
    %18 = vector.extract_strided_slice %11 {offsets = [0, 192], sizes = [8, 64], strides = [1, 1]} : vector<8x256xf32> to vector<8x64xf32>
    %19 = math.tanh %18 : vector<8x64xf32>
    %20 = vector.extract_strided_slice %17 {offsets = [0, 0], sizes = [8, 64], strides = [1, 1]} : vector<8x192xf32> to vector<8x64xf32>
    %21 = vector.extract_strided_slice %17 {offsets = [0, 64], sizes = [8, 64], strides = [1, 1]} : vector<8x192xf32> to vector<8x64xf32>
    %22 = vector.extract_strided_slice %17 {offsets = [0, 128], sizes = [8, 64], strides = [1, 1]} : vector<8x192xf32> to vector<8x64xf32>
    %23 = arith.mulf %20, %10 : vector<8x64xf32>
    %24 = arith.mulf %21, %19 : vector<8x64xf32>
    %25 = arith.addf %23, %24 : vector<8x64xf32>
    %26 = math.tanh %25 : vector<8x64xf32>
    %27 = arith.mulf %22, %26 : vector<8x64xf32>
    %c1_i32 = arith.constant 1 : i32
    %c0_13 = arith.constant 0 : index
    %c0_14 = arith.constant 0 : index
    %28 = vector.load %arg4[%c0_13, %c0_14] : memref<64x256xf32, #tpu.memory_space<vmem>>, vector<64x256xf32>
    %cst_15 = arith.constant dense<0.000000e+00> : vector<8x256xf32>
    %29 = tpu.matmul %27, %28, %cst_15 {dimension_numbers = #tpu.dot_dimension_numbers<[1], [0], [0], [1], [0, 0, 1, 1], [], []>} : vector<8x64xf32>, vector<64x256xf32>, vector<8x256xf32> -> vector<8x256xf32>
    %c0_16 = arith.constant 0 : index
    %c0_17 = arith.constant 0 : index
    %30 = vector.load %arg5[%c0_16, %c0_17] : memref<64x256xf32, #tpu.memory_space<vmem>>, vector<64x256xf32>
    %cst_18 = arith.constant dense<0.000000e+00> : vector<8x256xf32>
    %31 = tpu.matmul %10, %30, %cst_18 {dimension_numbers = #tpu.dot_dimension_numbers<[1], [0], [0], [1], [0, 0, 1, 1], [], []>} : vector<8x64xf32>, vector<64x256xf32>, vector<8x256xf32> -> vector<8x256xf32>
    %32 = arith.addf %29, %31 : vector<8x256xf32>
    %33 = arith.addf %32, %9 : vector<8x256xf32>
    %34 = vector.extract_strided_slice %33 {offsets = [0, 0], sizes = [8, 192], strides = [1, 1]} : vector<8x256xf32> to vector<8x192xf32>
    %35 = arith.negf %34 : vector<8x192xf32>
    %36 = math.exp %35 : vector<8x192xf32>
    %cst_19 = arith.constant 1.000000e+00 : f32
    %37 = vector.broadcast %cst_19 : f32 to vector<8x192xf32>
    %38 = arith.addf %37, %36 : vector<8x192xf32>
    %39 = arith.divf %37, %38 : vector<8x192xf32>
    %40 = vector.extract_strided_slice %33 {offsets = [0, 192], sizes = [8, 64], strides = [1, 1]} : vector<8x256xf32> to vector<8x64xf32>
    %41 = math.tanh %40 : vector<8x64xf32>
    %42 = vector.extract_strided_slice %39 {offsets = [0, 0], sizes = [8, 64], strides = [1, 1]} : vector<8x192xf32> to vector<8x64xf32>
    %43 = vector.extract_strided_slice %39 {offsets = [0, 64], sizes = [8, 64], strides = [1, 1]} : vector<8x192xf32> to vector<8x64xf32>
    %44 = vector.extract_strided_slice %39 {offsets = [0, 128], sizes = [8, 64], strides = [1, 1]} : vector<8x192xf32> to vector<8x64xf32>
    %45 = arith.mulf %42, %10 : vector<8x64xf32>
    %46 = arith.mulf %43, %41 : vector<8x64xf32>
    %47 = arith.addf %45, %46 : vector<8x64xf32>
    %48 = math.tanh %47 : vector<8x64xf32>
    %49 = arith.mulf %44, %48 : vector<8x64xf32>
    %c8_i32 = arith.constant 8 : i32
    %50 = arith.muli %c1_i32, %c8_i32 : i32
    %51 = arith.index_cast %50 : i32 to index
    %c0_20 = arith.constant 0 : index
    %52 = vector.load %arg14[%51, %c0_20] : memref<64x256xf32, #tpu.memory_space<vmem>>, vector<8x256xf32>
    %c0_21 = arith.constant 0 : index
    %c0_22 = arith.constant 0 : index
    %53 = vector.load %arg3[%c0_21, %c0_22] : memref<64x256xf32, #tpu.memory_space<vmem>>, vector<64x256xf32>
    %cst_23 = arith.constant dense<0.000000e+00> : vector<8x256xf32>
    %54 = tpu.matmul %27, %53, %cst_23 {dimension_numbers = #tpu.dot_dimension_numbers<[1], [0], [0], [1], [0, 0, 1, 1], [], []>} : vector<8x64xf32>, vector<64x256xf32>, vector<8x256xf32> -> vector<8x256xf32>
    %55 = arith.addf %52, %54 : vector<8x256xf32>
    %56 = vector.extract_strided_slice %55 {offsets = [0, 0], sizes = [8, 192], strides = [1, 1]} : vector<8x256xf32> to vector<8x192xf32>
    %57 = arith.negf %56 : vector<8x192xf32>
    %58 = math.exp %57 : vector<8x192xf32>
    %cst_24 = arith.constant 1.000000e+00 : f32
    %59 = vector.broadcast %cst_24 : f32 to vector<8x192xf32>
    %60 = arith.addf %59, %58 : vector<8x192xf32>
    %61 = arith.divf %59, %60 : vector<8x192xf32>
    %62 = vector.extract_strided_slice %55 {offsets = [0, 192], sizes = [8, 64], strides = [1, 1]} : vector<8x256xf32> to vector<8x64xf32>
    %63 = math.tanh %62 : vector<8x64xf32>
    %64 = vector.extract_strided_slice %61 {offsets = [0, 0], sizes = [8, 64], strides = [1, 1]} : vector<8x192xf32> to vector<8x64xf32>
    %65 = vector.extract_strided_slice %61 {offsets = [0, 64], sizes = [8, 64], strides = [1, 1]} : vector<8x192xf32> to vector<8x64xf32>
    %66 = vector.extract_strided_slice %61 {offsets = [0, 128], sizes = [8, 64], strides = [1, 1]} : vector<8x192xf32> to vector<8x64xf32>
    %67 = arith.mulf %64, %25 : vector<8x64xf32>
    %68 = arith.mulf %65, %63 : vector<8x64xf32>
    %69 = arith.addf %67, %68 : vector<8x64xf32>
    %70 = math.tanh %69 : vector<8x64xf32>
    %71 = arith.mulf %66, %70 : vector<8x64xf32>
    %c2_i32 = arith.constant 2 : i32
    %c0_25 = arith.constant 0 : index
    %c0_26 = arith.constant 0 : index
    %72 = vector.load %arg4[%c0_25, %c0_26] : memref<64x256xf32, #tpu.memory_space<vmem>>, vector<64x256xf32>
    %cst_27 = arith.constant dense<0.000000e+00> : vector<8x256xf32>
    %73 = tpu.matmul %71, %72, %cst_27 {dimension_numbers = #tpu.dot_dimension_numbers<[1], [0], [0], [1], [0, 0, 1, 1], [], []>} : vector<8x64xf32>, vector<64x256xf32>, vector<8x256xf32> -> vector<8x256xf32>
    %c0_28 = arith.constant 0 : index
    %c0_29 = arith.constant 0 : index
    %74 = vector.load %arg5[%c0_28, %c0_29] : memref<64x256xf32, #tpu.memory_space<vmem>>, vector<64x256xf32>
    %cst_30 = arith.constant dense<0.000000e+00> : vector<8x256xf32>
    %75 = tpu.matmul %49, %74, %cst_30 {dimension_numbers = #tpu.dot_dimension_numbers<[1], [0], [0], [1], [0, 0, 1, 1], [], []>} : vector<8x64xf32>, vector<64x256xf32>, vector<8x256xf32> -> vector<8x256xf32>
    %76 = arith.addf %73, %75 : vector<8x256xf32>
    %77 = arith.addf %76, %9 : vector<8x256xf32>
    %78 = vector.extract_strided_slice %77 {offsets = [0, 0], sizes = [8, 192], strides = [1, 1]} : vector<8x256xf32> to vector<8x192xf32>
    %79 = arith.negf %78 : vector<8x192xf32>
    %80 = math.exp %79 : vector<8x192xf32>
    %cst_31 = arith.constant 1.000000e+00 : f32
    %81 = vector.broadcast %cst_31 : f32 to vector<8x192xf32>
    %82 = arith.addf %81, %80 : vector<8x192xf32>
    %83 = arith.divf %81, %82 : vector<8x192xf32>
    %84 = vector.extract_strided_slice %77 {offsets = [0, 192], sizes = [8, 64], strides = [1, 1]} : vector<8x256xf32> to vector<8x64xf32>
    %85 = math.tanh %84 : vector<8x64xf32>
    %86 = vector.extract_strided_slice %83 {offsets = [0, 0], sizes = [8, 64], strides = [1, 1]} : vector<8x192xf32> to vector<8x64xf32>
    %87 = vector.extract_strided_slice %83 {offsets = [0, 64], sizes = [8, 64], strides = [1, 1]} : vector<8x192xf32> to vector<8x64xf32>
    %88 = vector.extract_strided_slice %83 {offsets = [0, 128], sizes = [8, 64], strides = [1, 1]} : vector<8x192xf32> to vector<8x64xf32>
    %89 = arith.mulf %86, %47 : vector<8x64xf32>
    %90 = arith.mulf %87, %85 : vector<8x64xf32>
    %91 = arith.addf %89, %90 : vector<8x64xf32>
    %92 = math.tanh %91 : vector<8x64xf32>
    %93 = arith.mulf %88, %92 : vector<8x64xf32>
    %c8_i32_32 = arith.constant 8 : i32
    %94 = arith.muli %c2_i32, %c8_i32_32 : i32
    %95 = arith.index_cast %94 : i32 to index
    %c0_33 = arith.constant 0 : index
    %96 = vector.load %arg14[%95, %c0_33] : memref<64x256xf32, #tpu.memory_space<vmem>>, vector<8x256xf32>
    %c0_34 = arith.constant 0 : index
    %c0_35 = arith.constant 0 : index
    %97 = vector.load %arg3[%c0_34, %c0_35] : memref<64x256xf32, #tpu.memory_space<vmem>>, vector<64x256xf32>
    %cst_36 = arith.constant dense<0.000000e+00> : vector<8x256xf32>
    %98 = tpu.matmul %71, %97, %cst_36 {dimension_numbers = #tpu.dot_dimension_numbers<[1], [0], [0], [1], [0, 0, 1, 1], [], []>} : vector<8x64xf32>, vector<64x256xf32>, vector<8x256xf32> -> vector<8x256xf32>
    %99 = arith.addf %96, %98 : vector<8x256xf32>
    %100 = vector.extract_strided_slice %99 {offsets = [0, 0], sizes = [8, 192], strides = [1, 1]} : vector<8x256xf32> to vector<8x192xf32>
    %101 = arith.negf %100 : vector<8x192xf32>
    %102 = math.exp %101 : vector<8x192xf32>
    %cst_37 = arith.constant 1.000000e+00 : f32
    %103 = vector.broadcast %cst_37 : f32 to vector<8x192xf32>
    %104 = arith.addf %103, %102 : vector<8x192xf32>
    %105 = arith.divf %103, %104 : vector<8x192xf32>
    %106 = vector.extract_strided_slice %99 {offsets = [0, 192], sizes = [8, 64], strides = [1, 1]} : vector<8x256xf32> to vector<8x64xf32>
    %107 = math.tanh %106 : vector<8x64xf32>
    %108 = vector.extract_strided_slice %105 {offsets = [0, 0], sizes = [8, 64], strides = [1, 1]} : vector<8x192xf32> to vector<8x64xf32>
    %109 = vector.extract_strided_slice %105 {offsets = [0, 64], sizes = [8, 64], strides = [1, 1]} : vector<8x192xf32> to vector<8x64xf32>
    %110 = vector.extract_strided_slice %105 {offsets = [0, 128], sizes = [8, 64], strides = [1, 1]} : vector<8x192xf32> to vector<8x64xf32>
    %111 = arith.mulf %108, %69 : vector<8x64xf32>
    %112 = arith.mulf %109, %107 : vector<8x64xf32>
    %113 = arith.addf %111, %112 : vector<8x64xf32>
    %114 = math.tanh %113 : vector<8x64xf32>
    %115 = arith.mulf %110, %114 : vector<8x64xf32>
    %c3_i32 = arith.constant 3 : i32
    %c0_38 = arith.constant 0 : index
    %c0_39 = arith.constant 0 : index
    %116 = vector.load %arg4[%c0_38, %c0_39] : memref<64x256xf32, #tpu.memory_space<vmem>>, vector<64x256xf32>
    %cst_40 = arith.constant dense<0.000000e+00> : vector<8x256xf32>
    %117 = tpu.matmul %115, %116, %cst_40 {dimension_numbers = #tpu.dot_dimension_numbers<[1], [0], [0], [1], [0, 0, 1, 1], [], []>} : vector<8x64xf32>, vector<64x256xf32>, vector<8x256xf32> -> vector<8x256xf32>
    %c0_41 = arith.constant 0 : index
    %c0_42 = arith.constant 0 : index
    %118 = vector.load %arg5[%c0_41, %c0_42] : memref<64x256xf32, #tpu.memory_space<vmem>>, vector<64x256xf32>
    %cst_43 = arith.constant dense<0.000000e+00> : vector<8x256xf32>
    %119 = tpu.matmul %93, %118, %cst_43 {dimension_numbers = #tpu.dot_dimension_numbers<[1], [0], [0], [1], [0, 0, 1, 1], [], []>} : vector<8x64xf32>, vector<64x256xf32>, vector<8x256xf32> -> vector<8x256xf32>
    %120 = arith.addf %117, %119 : vector<8x256xf32>
    %121 = arith.addf %120, %9 : vector<8x256xf32>
    %122 = vector.extract_strided_slice %121 {offsets = [0, 0], sizes = [8, 192], strides = [1, 1]} : vector<8x256xf32> to vector<8x192xf32>
    %123 = arith.negf %122 : vector<8x192xf32>
    %124 = math.exp %123 : vector<8x192xf32>
    %cst_44 = arith.constant 1.000000e+00 : f32
    %125 = vector.broadcast %cst_44 : f32 to vector<8x192xf32>
    %126 = arith.addf %125, %124 : vector<8x192xf32>
    %127 = arith.divf %125, %126 : vector<8x192xf32>
    %128 = vector.extract_strided_slice %121 {offsets = [0, 192], sizes = [8, 64], strides = [1, 1]} : vector<8x256xf32> to vector<8x64xf32>
    %129 = math.tanh %128 : vector<8x64xf32>
    %130 = vector.extract_strided_slice %127 {offsets = [0, 0], sizes = [8, 64], strides = [1, 1]} : vector<8x192xf32> to vector<8x64xf32>
    %131 = vector.extract_strided_slice %127 {offsets = [0, 64], sizes = [8, 64], strides = [1, 1]} : vector<8x192xf32> to vector<8x64xf32>
    %132 = vector.extract_strided_slice %127 {offsets = [0, 128], sizes = [8, 64], strides = [1, 1]} : vector<8x192xf32> to vector<8x64xf32>
    %133 = arith.mulf %130, %91 : vector<8x64xf32>
    %134 = arith.mulf %131, %129 : vector<8x64xf32>
    %135 = arith.addf %133, %134 : vector<8x64xf32>
    %136 = math.tanh %135 : vector<8x64xf32>
    %137 = arith.mulf %132, %136 : vector<8x64xf32>
    %c8_i32_45 = arith.constant 8 : i32
    %138 = arith.muli %c3_i32, %c8_i32_45 : i32
    %139 = arith.index_cast %138 : i32 to index
    %c0_46 = arith.constant 0 : index
    %140 = vector.load %arg14[%139, %c0_46] : memref<64x256xf32, #tpu.memory_space<vmem>>, vector<8x256xf32>
    %c0_47 = arith.constant 0 : index
    %c0_48 = arith.constant 0 : index
    %141 = vector.load %arg3[%c0_47, %c0_48] : memref<64x256xf32, #tpu.memory_space<vmem>>, vector<64x256xf32>
    %cst_49 = arith.constant dense<0.000000e+00> : vector<8x256xf32>
    %142 = tpu.matmul %115, %141, %cst_49 {dimension_numbers = #tpu.dot_dimension_numbers<[1], [0], [0], [1], [0, 0, 1, 1], [], []>} : vector<8x64xf32>, vector<64x256xf32>, vector<8x256xf32> -> vector<8x256xf32>
    %143 = arith.addf %140, %142 : vector<8x256xf32>
    %144 = vector.extract_strided_slice %143 {offsets = [0, 0], sizes = [8, 192], strides = [1, 1]} : vector<8x256xf32> to vector<8x192xf32>
    %145 = arith.negf %144 : vector<8x192xf32>
    %146 = math.exp %145 : vector<8x192xf32>
    %cst_50 = arith.constant 1.000000e+00 : f32
    %147 = vector.broadcast %cst_50 : f32 to vector<8x192xf32>
    %148 = arith.addf %147, %146 : vector<8x192xf32>
    %149 = arith.divf %147, %148 : vector<8x192xf32>
    %150 = vector.extract_strided_slice %143 {offsets = [0, 192], sizes = [8, 64], strides = [1, 1]} : vector<8x256xf32> to vector<8x64xf32>
    %151 = math.tanh %150 : vector<8x64xf32>
    %152 = vector.extract_strided_slice %149 {offsets = [0, 0], sizes = [8, 64], strides = [1, 1]} : vector<8x192xf32> to vector<8x64xf32>
    %153 = vector.extract_strided_slice %149 {offsets = [0, 64], sizes = [8, 64], strides = [1, 1]} : vector<8x192xf32> to vector<8x64xf32>
    %154 = vector.extract_strided_slice %149 {offsets = [0, 128], sizes = [8, 64], strides = [1, 1]} : vector<8x192xf32> to vector<8x64xf32>
    %155 = arith.mulf %152, %113 : vector<8x64xf32>
    %156 = arith.mulf %153, %151 : vector<8x64xf32>
    %157 = arith.addf %155, %156 : vector<8x64xf32>
    %158 = math.tanh %157 : vector<8x64xf32>
    %159 = arith.mulf %154, %158 : vector<8x64xf32>
    %c4_i32 = arith.constant 4 : i32
    %c0_51 = arith.constant 0 : index
    %c0_52 = arith.constant 0 : index
    %160 = vector.load %arg4[%c0_51, %c0_52] : memref<64x256xf32, #tpu.memory_space<vmem>>, vector<64x256xf32>
    %cst_53 = arith.constant dense<0.000000e+00> : vector<8x256xf32>
    %161 = tpu.matmul %159, %160, %cst_53 {dimension_numbers = #tpu.dot_dimension_numbers<[1], [0], [0], [1], [0, 0, 1, 1], [], []>} : vector<8x64xf32>, vector<64x256xf32>, vector<8x256xf32> -> vector<8x256xf32>
    %c0_54 = arith.constant 0 : index
    %c0_55 = arith.constant 0 : index
    %162 = vector.load %arg5[%c0_54, %c0_55] : memref<64x256xf32, #tpu.memory_space<vmem>>, vector<64x256xf32>
    %cst_56 = arith.constant dense<0.000000e+00> : vector<8x256xf32>
    %163 = tpu.matmul %137, %162, %cst_56 {dimension_numbers = #tpu.dot_dimension_numbers<[1], [0], [0], [1], [0, 0, 1, 1], [], []>} : vector<8x64xf32>, vector<64x256xf32>, vector<8x256xf32> -> vector<8x256xf32>
    %164 = arith.addf %161, %163 : vector<8x256xf32>
    %165 = arith.addf %164, %9 : vector<8x256xf32>
    %166 = vector.extract_strided_slice %165 {offsets = [0, 0], sizes = [8, 192], strides = [1, 1]} : vector<8x256xf32> to vector<8x192xf32>
    %167 = arith.negf %166 : vector<8x192xf32>
    %168 = math.exp %167 : vector<8x192xf32>
    %cst_57 = arith.constant 1.000000e+00 : f32
    %169 = vector.broadcast %cst_57 : f32 to vector<8x192xf32>
    %170 = arith.addf %169, %168 : vector<8x192xf32>
    %171 = arith.divf %169, %170 : vector<8x192xf32>
    %172 = vector.extract_strided_slice %165 {offsets = [0, 192], sizes = [8, 64], strides = [1, 1]} : vector<8x256xf32> to vector<8x64xf32>
    %173 = math.tanh %172 : vector<8x64xf32>
    %174 = vector.extract_strided_slice %171 {offsets = [0, 0], sizes = [8, 64], strides = [1, 1]} : vector<8x192xf32> to vector<8x64xf32>
    %175 = vector.extract_strided_slice %171 {offsets = [0, 64], sizes = [8, 64], strides = [1, 1]} : vector<8x192xf32> to vector<8x64xf32>
    %176 = vector.extract_strided_slice %171 {offsets = [0, 128], sizes = [8, 64], strides = [1, 1]} : vector<8x192xf32> to vector<8x64xf32>
    %177 = arith.mulf %174, %135 : vector<8x64xf32>
    %178 = arith.mulf %175, %173 : vector<8x64xf32>
    %179 = arith.addf %177, %178 : vector<8x64xf32>
    %180 = math.tanh %179 : vector<8x64xf32>
    %181 = arith.mulf %176, %180 : vector<8x64xf32>
    %c8_i32_58 = arith.constant 8 : i32
    %182 = arith.muli %c4_i32, %c8_i32_58 : i32
    %183 = arith.index_cast %182 : i32 to index
    %c0_59 = arith.constant 0 : index
    %184 = vector.load %arg14[%183, %c0_59] : memref<64x256xf32, #tpu.memory_space<vmem>>, vector<8x256xf32>
    %c0_60 = arith.constant 0 : index
    %c0_61 = arith.constant 0 : index
    %185 = vector.load %arg3[%c0_60, %c0_61] : memref<64x256xf32, #tpu.memory_space<vmem>>, vector<64x256xf32>
    %cst_62 = arith.constant dense<0.000000e+00> : vector<8x256xf32>
    %186 = tpu.matmul %159, %185, %cst_62 {dimension_numbers = #tpu.dot_dimension_numbers<[1], [0], [0], [1], [0, 0, 1, 1], [], []>} : vector<8x64xf32>, vector<64x256xf32>, vector<8x256xf32> -> vector<8x256xf32>
    %187 = arith.addf %184, %186 : vector<8x256xf32>
    %188 = vector.extract_strided_slice %187 {offsets = [0, 0], sizes = [8, 192], strides = [1, 1]} : vector<8x256xf32> to vector<8x192xf32>
    %189 = arith.negf %188 : vector<8x192xf32>
    %190 = math.exp %189 : vector<8x192xf32>
    %cst_63 = arith.constant 1.000000e+00 : f32
    %191 = vector.broadcast %cst_63 : f32 to vector<8x192xf32>
    %192 = arith.addf %191, %190 : vector<8x192xf32>
    %193 = arith.divf %191, %192 : vector<8x192xf32>
    %194 = vector.extract_strided_slice %187 {offsets = [0, 192], sizes = [8, 64], strides = [1, 1]} : vector<8x256xf32> to vector<8x64xf32>
    %195 = math.tanh %194 : vector<8x64xf32>
    %196 = vector.extract_strided_slice %193 {offsets = [0, 0], sizes = [8, 64], strides = [1, 1]} : vector<8x192xf32> to vector<8x64xf32>
    %197 = vector.extract_strided_slice %193 {offsets = [0, 64], sizes = [8, 64], strides = [1, 1]} : vector<8x192xf32> to vector<8x64xf32>
    %198 = vector.extract_strided_slice %193 {offsets = [0, 128], sizes = [8, 64], strides = [1, 1]} : vector<8x192xf32> to vector<8x64xf32>
    %199 = arith.mulf %196, %157 : vector<8x64xf32>
    %200 = arith.mulf %197, %195 : vector<8x64xf32>
    %201 = arith.addf %199, %200 : vector<8x64xf32>
    %202 = math.tanh %201 : vector<8x64xf32>
    %203 = arith.mulf %198, %202 : vector<8x64xf32>
    %c5_i32 = arith.constant 5 : i32
    %c0_64 = arith.constant 0 : index
    %c0_65 = arith.constant 0 : index
    %204 = vector.load %arg4[%c0_64, %c0_65] : memref<64x256xf32, #tpu.memory_space<vmem>>, vector<64x256xf32>
    %cst_66 = arith.constant dense<0.000000e+00> : vector<8x256xf32>
    %205 = tpu.matmul %203, %204, %cst_66 {dimension_numbers = #tpu.dot_dimension_numbers<[1], [0], [0], [1], [0, 0, 1, 1], [], []>} : vector<8x64xf32>, vector<64x256xf32>, vector<8x256xf32> -> vector<8x256xf32>
    %c0_67 = arith.constant 0 : index
    %c0_68 = arith.constant 0 : index
    %206 = vector.load %arg5[%c0_67, %c0_68] : memref<64x256xf32, #tpu.memory_space<vmem>>, vector<64x256xf32>
    %cst_69 = arith.constant dense<0.000000e+00> : vector<8x256xf32>
    %207 = tpu.matmul %181, %206, %cst_69 {dimension_numbers = #tpu.dot_dimension_numbers<[1], [0], [0], [1], [0, 0, 1, 1], [], []>} : vector<8x64xf32>, vector<64x256xf32>, vector<8x256xf32> -> vector<8x256xf32>
    %208 = arith.addf %205, %207 : vector<8x256xf32>
    %209 = arith.addf %208, %9 : vector<8x256xf32>
    %210 = vector.extract_strided_slice %209 {offsets = [0, 0], sizes = [8, 192], strides = [1, 1]} : vector<8x256xf32> to vector<8x192xf32>
    %211 = arith.negf %210 : vector<8x192xf32>
    %212 = math.exp %211 : vector<8x192xf32>
    %cst_70 = arith.constant 1.000000e+00 : f32
    %213 = vector.broadcast %cst_70 : f32 to vector<8x192xf32>
    %214 = arith.addf %213, %212 : vector<8x192xf32>
    %215 = arith.divf %213, %214 : vector<8x192xf32>
    %216 = vector.extract_strided_slice %209 {offsets = [0, 192], sizes = [8, 64], strides = [1, 1]} : vector<8x256xf32> to vector<8x64xf32>
    %217 = math.tanh %216 : vector<8x64xf32>
    %218 = vector.extract_strided_slice %215 {offsets = [0, 0], sizes = [8, 64], strides = [1, 1]} : vector<8x192xf32> to vector<8x64xf32>
    %219 = vector.extract_strided_slice %215 {offsets = [0, 64], sizes = [8, 64], strides = [1, 1]} : vector<8x192xf32> to vector<8x64xf32>
    %220 = vector.extract_strided_slice %215 {offsets = [0, 128], sizes = [8, 64], strides = [1, 1]} : vector<8x192xf32> to vector<8x64xf32>
    %221 = arith.mulf %218, %179 : vector<8x64xf32>
    %222 = arith.mulf %219, %217 : vector<8x64xf32>
    %223 = arith.addf %221, %222 : vector<8x64xf32>
    %224 = math.tanh %223 : vector<8x64xf32>
    %225 = arith.mulf %220, %224 : vector<8x64xf32>
    %c8_i32_71 = arith.constant 8 : i32
    %226 = arith.muli %c5_i32, %c8_i32_71 : i32
    %227 = arith.index_cast %226 : i32 to index
    %c0_72 = arith.constant 0 : index
    %228 = vector.load %arg14[%227, %c0_72] : memref<64x256xf32, #tpu.memory_space<vmem>>, vector<8x256xf32>
    %c0_73 = arith.constant 0 : index
    %c0_74 = arith.constant 0 : index
    %229 = vector.load %arg3[%c0_73, %c0_74] : memref<64x256xf32, #tpu.memory_space<vmem>>, vector<64x256xf32>
    %cst_75 = arith.constant dense<0.000000e+00> : vector<8x256xf32>
    %230 = tpu.matmul %203, %229, %cst_75 {dimension_numbers = #tpu.dot_dimension_numbers<[1], [0], [0], [1], [0, 0, 1, 1], [], []>} : vector<8x64xf32>, vector<64x256xf32>, vector<8x256xf32> -> vector<8x256xf32>
    %231 = arith.addf %228, %230 : vector<8x256xf32>
    %232 = vector.extract_strided_slice %231 {offsets = [0, 0], sizes = [8, 192], strides = [1, 1]} : vector<8x256xf32> to vector<8x192xf32>
    %233 = arith.negf %232 : vector<8x192xf32>
    %234 = math.exp %233 : vector<8x192xf32>
    %cst_76 = arith.constant 1.000000e+00 : f32
    %235 = vector.broadcast %cst_76 : f32 to vector<8x192xf32>
    %236 = arith.addf %235, %234 : vector<8x192xf32>
    %237 = arith.divf %235, %236 : vector<8x192xf32>
    %238 = vector.extract_strided_slice %231 {offsets = [0, 192], sizes = [8, 64], strides = [1, 1]} : vector<8x256xf32> to vector<8x64xf32>
    %239 = math.tanh %238 : vector<8x64xf32>
    %240 = vector.extract_strided_slice %237 {offsets = [0, 0], sizes = [8, 64], strides = [1, 1]} : vector<8x192xf32> to vector<8x64xf32>
    %241 = vector.extract_strided_slice %237 {offsets = [0, 64], sizes = [8, 64], strides = [1, 1]} : vector<8x192xf32> to vector<8x64xf32>
    %242 = vector.extract_strided_slice %237 {offsets = [0, 128], sizes = [8, 64], strides = [1, 1]} : vector<8x192xf32> to vector<8x64xf32>
    %243 = arith.mulf %240, %201 : vector<8x64xf32>
    %244 = arith.mulf %241, %239 : vector<8x64xf32>
    %245 = arith.addf %243, %244 : vector<8x64xf32>
    %246 = math.tanh %245 : vector<8x64xf32>
    %247 = arith.mulf %242, %246 : vector<8x64xf32>
    %c6_i32 = arith.constant 6 : i32
    %c0_77 = arith.constant 0 : index
    %c0_78 = arith.constant 0 : index
    %248 = vector.load %arg4[%c0_77, %c0_78] : memref<64x256xf32, #tpu.memory_space<vmem>>, vector<64x256xf32>
    %cst_79 = arith.constant dense<0.000000e+00> : vector<8x256xf32>
    %249 = tpu.matmul %247, %248, %cst_79 {dimension_numbers = #tpu.dot_dimension_numbers<[1], [0], [0], [1], [0, 0, 1, 1], [], []>} : vector<8x64xf32>, vector<64x256xf32>, vector<8x256xf32> -> vector<8x256xf32>
    %c0_80 = arith.constant 0 : index
    %c0_81 = arith.constant 0 : index
    %250 = vector.load %arg5[%c0_80, %c0_81] : memref<64x256xf32, #tpu.memory_space<vmem>>, vector<64x256xf32>
    %cst_82 = arith.constant dense<0.000000e+00> : vector<8x256xf32>
    %251 = tpu.matmul %225, %250, %cst_82 {dimension_numbers = #tpu.dot_dimension_numbers<[1], [0], [0], [1], [0, 0, 1, 1], [], []>} : vector<8x64xf32>, vector<64x256xf32>, vector<8x256xf32> -> vector<8x256xf32>
    %252 = arith.addf %249, %251 : vector<8x256xf32>
    %253 = arith.addf %252, %9 : vector<8x256xf32>
    %254 = vector.extract_strided_slice %253 {offsets = [0, 0], sizes = [8, 192], strides = [1, 1]} : vector<8x256xf32> to vector<8x192xf32>
    %255 = arith.negf %254 : vector<8x192xf32>
    %256 = math.exp %255 : vector<8x192xf32>
    %cst_83 = arith.constant 1.000000e+00 : f32
    %257 = vector.broadcast %cst_83 : f32 to vector<8x192xf32>
    %258 = arith.addf %257, %256 : vector<8x192xf32>
    %259 = arith.divf %257, %258 : vector<8x192xf32>
    %260 = vector.extract_strided_slice %253 {offsets = [0, 192], sizes = [8, 64], strides = [1, 1]} : vector<8x256xf32> to vector<8x64xf32>
    %261 = math.tanh %260 : vector<8x64xf32>
    %262 = vector.extract_strided_slice %259 {offsets = [0, 0], sizes = [8, 64], strides = [1, 1]} : vector<8x192xf32> to vector<8x64xf32>
    %263 = vector.extract_strided_slice %259 {offsets = [0, 64], sizes = [8, 64], strides = [1, 1]} : vector<8x192xf32> to vector<8x64xf32>
    %264 = vector.extract_strided_slice %259 {offsets = [0, 128], sizes = [8, 64], strides = [1, 1]} : vector<8x192xf32> to vector<8x64xf32>
    %265 = arith.mulf %262, %223 : vector<8x64xf32>
    %266 = arith.mulf %263, %261 : vector<8x64xf32>
    %267 = arith.addf %265, %266 : vector<8x64xf32>
    %268 = math.tanh %267 : vector<8x64xf32>
    %269 = arith.mulf %264, %268 : vector<8x64xf32>
    %c8_i32_84 = arith.constant 8 : i32
    %270 = arith.muli %c6_i32, %c8_i32_84 : i32
    %271 = arith.index_cast %270 : i32 to index
    %c0_85 = arith.constant 0 : index
    %272 = vector.load %arg14[%271, %c0_85] : memref<64x256xf32, #tpu.memory_space<vmem>>, vector<8x256xf32>
    %c0_86 = arith.constant 0 : index
    %c0_87 = arith.constant 0 : index
    %273 = vector.load %arg3[%c0_86, %c0_87] : memref<64x256xf32, #tpu.memory_space<vmem>>, vector<64x256xf32>
    %cst_88 = arith.constant dense<0.000000e+00> : vector<8x256xf32>
    %274 = tpu.matmul %247, %273, %cst_88 {dimension_numbers = #tpu.dot_dimension_numbers<[1], [0], [0], [1], [0, 0, 1, 1], [], []>} : vector<8x64xf32>, vector<64x256xf32>, vector<8x256xf32> -> vector<8x256xf32>
    %275 = arith.addf %272, %274 : vector<8x256xf32>
    %276 = vector.extract_strided_slice %275 {offsets = [0, 0], sizes = [8, 192], strides = [1, 1]} : vector<8x256xf32> to vector<8x192xf32>
    %277 = arith.negf %276 : vector<8x192xf32>
    %278 = math.exp %277 : vector<8x192xf32>
    %cst_89 = arith.constant 1.000000e+00 : f32
    %279 = vector.broadcast %cst_89 : f32 to vector<8x192xf32>
    %280 = arith.addf %279, %278 : vector<8x192xf32>
    %281 = arith.divf %279, %280 : vector<8x192xf32>
    %282 = vector.extract_strided_slice %275 {offsets = [0, 192], sizes = [8, 64], strides = [1, 1]} : vector<8x256xf32> to vector<8x64xf32>
    %283 = math.tanh %282 : vector<8x64xf32>
    %284 = vector.extract_strided_slice %281 {offsets = [0, 0], sizes = [8, 64], strides = [1, 1]} : vector<8x192xf32> to vector<8x64xf32>
    %285 = vector.extract_strided_slice %281 {offsets = [0, 64], sizes = [8, 64], strides = [1, 1]} : vector<8x192xf32> to vector<8x64xf32>
    %286 = vector.extract_strided_slice %281 {offsets = [0, 128], sizes = [8, 64], strides = [1, 1]} : vector<8x192xf32> to vector<8x64xf32>
    %287 = arith.mulf %284, %245 : vector<8x64xf32>
    %288 = arith.mulf %285, %283 : vector<8x64xf32>
    %289 = arith.addf %287, %288 : vector<8x64xf32>
    %290 = math.tanh %289 : vector<8x64xf32>
    %291 = arith.mulf %286, %290 : vector<8x64xf32>
    %c7_i32 = arith.constant 7 : i32
    %c0_90 = arith.constant 0 : index
    %c0_91 = arith.constant 0 : index
    %292 = vector.load %arg4[%c0_90, %c0_91] : memref<64x256xf32, #tpu.memory_space<vmem>>, vector<64x256xf32>
    %cst_92 = arith.constant dense<0.000000e+00> : vector<8x256xf32>
    %293 = tpu.matmul %291, %292, %cst_92 {dimension_numbers = #tpu.dot_dimension_numbers<[1], [0], [0], [1], [0, 0, 1, 1], [], []>} : vector<8x64xf32>, vector<64x256xf32>, vector<8x256xf32> -> vector<8x256xf32>
    %c0_93 = arith.constant 0 : index
    %c0_94 = arith.constant 0 : index
    %294 = vector.load %arg5[%c0_93, %c0_94] : memref<64x256xf32, #tpu.memory_space<vmem>>, vector<64x256xf32>
    %cst_95 = arith.constant dense<0.000000e+00> : vector<8x256xf32>
    %295 = tpu.matmul %269, %294, %cst_95 {dimension_numbers = #tpu.dot_dimension_numbers<[1], [0], [0], [1], [0, 0, 1, 1], [], []>} : vector<8x64xf32>, vector<64x256xf32>, vector<8x256xf32> -> vector<8x256xf32>
    %296 = arith.addf %293, %295 : vector<8x256xf32>
    %297 = arith.addf %296, %9 : vector<8x256xf32>
    %298 = vector.extract_strided_slice %297 {offsets = [0, 0], sizes = [8, 192], strides = [1, 1]} : vector<8x256xf32> to vector<8x192xf32>
    %299 = arith.negf %298 : vector<8x192xf32>
    %300 = math.exp %299 : vector<8x192xf32>
    %cst_96 = arith.constant 1.000000e+00 : f32
    %301 = vector.broadcast %cst_96 : f32 to vector<8x192xf32>
    %302 = arith.addf %301, %300 : vector<8x192xf32>
    %303 = arith.divf %301, %302 : vector<8x192xf32>
    %304 = vector.extract_strided_slice %297 {offsets = [0, 192], sizes = [8, 64], strides = [1, 1]} : vector<8x256xf32> to vector<8x64xf32>
    %305 = math.tanh %304 : vector<8x64xf32>
    %306 = vector.extract_strided_slice %303 {offsets = [0, 0], sizes = [8, 64], strides = [1, 1]} : vector<8x192xf32> to vector<8x64xf32>
    %307 = vector.extract_strided_slice %303 {offsets = [0, 64], sizes = [8, 64], strides = [1, 1]} : vector<8x192xf32> to vector<8x64xf32>
    %308 = vector.extract_strided_slice %303 {offsets = [0, 128], sizes = [8, 64], strides = [1, 1]} : vector<8x192xf32> to vector<8x64xf32>
    %309 = arith.mulf %306, %267 : vector<8x64xf32>
    %310 = arith.mulf %307, %305 : vector<8x64xf32>
    %311 = arith.addf %309, %310 : vector<8x64xf32>
    %312 = math.tanh %311 : vector<8x64xf32>
    %313 = arith.mulf %308, %312 : vector<8x64xf32>
    %c8_i32_97 = arith.constant 8 : i32
    %314 = arith.muli %c7_i32, %c8_i32_97 : i32
    %315 = arith.index_cast %314 : i32 to index
    %c0_98 = arith.constant 0 : index
    %316 = vector.load %arg14[%315, %c0_98] : memref<64x256xf32, #tpu.memory_space<vmem>>, vector<8x256xf32>
    %c0_99 = arith.constant 0 : index
    %c0_100 = arith.constant 0 : index
    %317 = vector.load %arg3[%c0_99, %c0_100] : memref<64x256xf32, #tpu.memory_space<vmem>>, vector<64x256xf32>
    %cst_101 = arith.constant dense<0.000000e+00> : vector<8x256xf32>
    %318 = tpu.matmul %291, %317, %cst_101 {dimension_numbers = #tpu.dot_dimension_numbers<[1], [0], [0], [1], [0, 0, 1, 1], [], []>} : vector<8x64xf32>, vector<64x256xf32>, vector<8x256xf32> -> vector<8x256xf32>
    %319 = arith.addf %316, %318 : vector<8x256xf32>
    %320 = vector.extract_strided_slice %319 {offsets = [0, 0], sizes = [8, 192], strides = [1, 1]} : vector<8x256xf32> to vector<8x192xf32>
    %321 = arith.negf %320 : vector<8x192xf32>
    %322 = math.exp %321 : vector<8x192xf32>
    %cst_102 = arith.constant 1.000000e+00 : f32
    %323 = vector.broadcast %cst_102 : f32 to vector<8x192xf32>
    %324 = arith.addf %323, %322 : vector<8x192xf32>
    %325 = arith.divf %323, %324 : vector<8x192xf32>
    %326 = vector.extract_strided_slice %319 {offsets = [0, 192], sizes = [8, 64], strides = [1, 1]} : vector<8x256xf32> to vector<8x64xf32>
    %327 = math.tanh %326 : vector<8x64xf32>
    %328 = vector.extract_strided_slice %325 {offsets = [0, 0], sizes = [8, 64], strides = [1, 1]} : vector<8x192xf32> to vector<8x64xf32>
    %329 = vector.extract_strided_slice %325 {offsets = [0, 64], sizes = [8, 64], strides = [1, 1]} : vector<8x192xf32> to vector<8x64xf32>
    %330 = vector.extract_strided_slice %325 {offsets = [0, 128], sizes = [8, 64], strides = [1, 1]} : vector<8x192xf32> to vector<8x64xf32>
    %331 = arith.mulf %328, %289 : vector<8x64xf32>
    %332 = arith.mulf %329, %327 : vector<8x64xf32>
    %333 = arith.addf %331, %332 : vector<8x64xf32>
    %334 = math.tanh %333 : vector<8x64xf32>
    %335 = arith.mulf %330, %334 : vector<8x64xf32>
    %c7_i32_103 = arith.constant 7 : i32
    %c0_104 = arith.constant 0 : index
    %c0_105 = arith.constant 0 : index
    %336 = vector.load %arg4[%c0_104, %c0_105] : memref<64x256xf32, #tpu.memory_space<vmem>>, vector<64x256xf32>
    %cst_106 = arith.constant dense<0.000000e+00> : vector<8x256xf32>
    %337 = tpu.matmul %335, %336, %cst_106 {dimension_numbers = #tpu.dot_dimension_numbers<[1], [0], [0], [1], [0, 0, 1, 1], [], []>} : vector<8x64xf32>, vector<64x256xf32>, vector<8x256xf32> -> vector<8x256xf32>
    %c0_107 = arith.constant 0 : index
    %c0_108 = arith.constant 0 : index
    %338 = vector.load %arg5[%c0_107, %c0_108] : memref<64x256xf32, #tpu.memory_space<vmem>>, vector<64x256xf32>
    %cst_109 = arith.constant dense<0.000000e+00> : vector<8x256xf32>
    %339 = tpu.matmul %313, %338, %cst_109 {dimension_numbers = #tpu.dot_dimension_numbers<[1], [0], [0], [1], [0, 0, 1, 1], [], []>} : vector<8x64xf32>, vector<64x256xf32>, vector<8x256xf32> -> vector<8x256xf32>
    %340 = arith.addf %337, %339 : vector<8x256xf32>
    %341 = arith.addf %340, %9 : vector<8x256xf32>
    %342 = vector.extract_strided_slice %341 {offsets = [0, 0], sizes = [8, 192], strides = [1, 1]} : vector<8x256xf32> to vector<8x192xf32>
    %343 = arith.negf %342 : vector<8x192xf32>
    %344 = math.exp %343 : vector<8x192xf32>
    %cst_110 = arith.constant 1.000000e+00 : f32
    %345 = vector.broadcast %cst_110 : f32 to vector<8x192xf32>
    %346 = arith.addf %345, %344 : vector<8x192xf32>
    %347 = arith.divf %345, %346 : vector<8x192xf32>
    %348 = vector.extract_strided_slice %341 {offsets = [0, 192], sizes = [8, 64], strides = [1, 1]} : vector<8x256xf32> to vector<8x64xf32>
    %349 = math.tanh %348 : vector<8x64xf32>
    %350 = vector.extract_strided_slice %347 {offsets = [0, 0], sizes = [8, 64], strides = [1, 1]} : vector<8x192xf32> to vector<8x64xf32>
    %351 = vector.extract_strided_slice %347 {offsets = [0, 64], sizes = [8, 64], strides = [1, 1]} : vector<8x192xf32> to vector<8x64xf32>
    %352 = vector.extract_strided_slice %347 {offsets = [0, 128], sizes = [8, 64], strides = [1, 1]} : vector<8x192xf32> to vector<8x64xf32>
    %353 = arith.mulf %350, %311 : vector<8x64xf32>
    %354 = arith.mulf %351, %349 : vector<8x64xf32>
    %355 = arith.addf %353, %354 : vector<8x64xf32>
    %356 = math.tanh %355 : vector<8x64xf32>
    %357 = arith.mulf %352, %356 : vector<8x64xf32>
    %c0_111 = arith.constant 0 : index
    %c0_112 = arith.constant 0 : index
    %358 = vector.load %arg7[%c0_111, %c0_112] : memref<64x64xf32, #tpu.memory_space<vmem>>, vector<64x64xf32>
    %cst_113 = arith.constant dense<0.000000e+00> : vector<8x64xf32>
    %359 = tpu.matmul %357, %358, %cst_113 {dimension_numbers = #tpu.dot_dimension_numbers<[1], [0], [0], [1], [0, 0, 1, 1], [], []>} : vector<8x64xf32>, vector<64x64xf32>, vector<8x64xf32> -> vector<8x64xf32>
    %c0_114 = arith.constant 0 : index
    %c0_115 = arith.constant 0 : index
    %360 = vector.load %arg8[%c0_114, %c0_115] : memref<1x64xf32, #tpu.memory_space<vmem>>, vector<1x64xf32>
    %361 = vector.broadcast %360 : vector<1x64xf32> to vector<8x64xf32>
    %362 = arith.addf %359, %361 : vector<8x64xf32>
    %cst_116 = arith.constant 0.000000e+00 : f32
    %363 = vector.broadcast %cst_116 : f32 to vector<8x64xf32>
    %364 = arith.cmpf ogt, %362, %363 : vector<8x64xf32>
    %cst_117 = arith.constant 0.00999999977 : f32
    %365 = vector.broadcast %cst_117 : f32 to vector<8x64xf32>
    %366 = arith.mulf %365, %362 : vector<8x64xf32>
    %367 = arith.select %364, %362, %366 : vector<8x64xi1>, vector<8x64xf32>
    %c0_118 = arith.constant 0 : index
    %c0_119 = arith.constant 0 : index
    %368 = vector.load %arg9[%c0_118, %c0_119] : memref<64x64xf32, #tpu.memory_space<vmem>>, vector<64x64xf32>
    %cst_120 = arith.constant dense<0.000000e+00> : vector<8x64xf32>
    %369 = tpu.matmul %367, %368, %cst_120 {dimension_numbers = #tpu.dot_dimension_numbers<[1], [0], [0], [1], [0, 0, 1, 1], [], []>} : vector<8x64xf32>, vector<64x64xf32>, vector<8x64xf32> -> vector<8x64xf32>
    %c0_121 = arith.constant 0 : index
    %c0_122 = arith.constant 0 : index
    %370 = vector.load %arg10[%c0_121, %c0_122] : memref<1x64xf32, #tpu.memory_space<vmem>>, vector<1x64xf32>
    %371 = vector.broadcast %370 : vector<1x64xf32> to vector<8x64xf32>
    %372 = arith.addf %369, %371 : vector<8x64xf32>
    %cst_123 = arith.constant 0.000000e+00 : f32
    %373 = vector.broadcast %cst_123 : f32 to vector<8x64xf32>
    %374 = arith.cmpf ogt, %372, %373 : vector<8x64xf32>
    %cst_124 = arith.constant 0.00999999977 : f32
    %375 = vector.broadcast %cst_124 : f32 to vector<8x64xf32>
    %376 = arith.mulf %375, %372 : vector<8x64xf32>
    %377 = arith.select %374, %372, %376 : vector<8x64xi1>, vector<8x64xf32>
    %378 = arith.addf %377, %357 : vector<8x64xf32>
    %c0_125 = arith.constant 0 : index
    %c0_126 = arith.constant 0 : index
    %379 = vector.load %arg11[%c0_125, %c0_126] : memref<1x64xf32, #tpu.memory_space<vmem>>, vector<1x64xf32>
    %380 = vector.broadcast %379 : vector<1x64xf32> to vector<8x64xf32>
    %381 = arith.mulf %378, %380 : vector<8x64xf32>
    %cst_127 = arith.constant dense<0.000000e+00> : vector<8xf32>
    %382 = vector.multi_reduction <add>, %381, %cst_127 [1] : vector<8x64xf32> to vector<8xf32>
    %383 = vector.shape_cast %382 : vector<8xf32> to vector<8x1xf32>
    %c0_128 = arith.constant 0 : index
    %c0_129 = arith.constant 0 : index
    %384 = vector.load %arg12[%c0_128, %c0_129] : memref<1x1xf32, #tpu.memory_space<vmem>>, vector<1x1xf32>
    %385 = vector.broadcast %384 : vector<1x1xf32> to vector<8x1xf32>
    %386 = arith.addf %383, %385 : vector<8x1xf32>
    %cst_130 = arith.constant 0.000000e+00 : f32
    %387 = vector.broadcast %cst_130 : f32 to vector<8x1xf32>
    %388 = arith.cmpf ogt, %386, %387 : vector<8x1xf32>
    %cst_131 = arith.constant 0.00999999977 : f32
    %389 = vector.broadcast %cst_131 : f32 to vector<8x1xf32>
    %390 = arith.mulf %389, %386 : vector<8x1xf32>
    %391 = arith.select %388, %386, %390 : vector<8x1xi1>, vector<8x1xf32>
    %c0_132 = arith.constant 0 : index
    %c0_133 = arith.constant 0 : index
    %392 = vector.load %arg13[%c0_132, %c0_133] : memref<8x1xf32, #tpu.memory_space<vmem>>, vector<8x1xf32>
    tpu.vector_store %arg13[%c0_132, %c0_133], %391 {strides = array<i32>} : memref<8x1xf32, #tpu.memory_space<vmem>>, vector<8x1xf32>,
    return
  }
}

</mosaic_0001>

<bundles_post_ra>
// kernel: tte_forward.1
= control target key start
LH: loop header
LB: loop body
LE: loop exit
PB: predicated region body
PF: predicated region fallthrough
CT: control target
= control target key end

     0   :  { %s4335_s0 = inlined_call_operand.vmem [shape: f32[64,10], index: 0, kind: input, shape index: {}]   ;;  %s4336_s1 = inlined_call_operand.hbm [shape: f32[10,256], index: 1, kind: input, shape index: {}]   ;;  %s4337_s2 = inlined_call_operand.vmem [shape: f32[1,256], index: 2, kind: input, shape index: {}]   ;;  %s4338_s3 = inlined_call_operand.vmem [shape: f32[64,256], index: 3, kind: input, shape index: {}]   ;;  %s4339_s4 = inlined_call_operand.hbm [shape: f32[64,256], index: 4, kind: input, shape index: {}]   ;;  %s4340_s5 = inlined_call_operand.hbm [shape: f32[64,256], index: 5, kind: input, shape index: {}]   ;;  %s4341_s6 = inlined_call_operand.vmem [shape: f32[1,256], index: 6, kind: input, shape index: {}]   ;;  %s4342_s7 = inlined_call_operand.hbm [shape: f32[64,64], index: 7, kind: input, shape index: {}]   ;;  %s4343_s8 = inlined_call_operand.vmem [shape: f32[1,64], index: 8, kind: input, shape index: {}]   ;;  %s4344_s9 = inlined_call_operand.hbm [shape: f32[64,64], index: 9, kind: input, shape index: {}]   ;;  %s4345_s10 = inlined_call_operand.hbm [shape: f32[1,64], index: 10, kind: input, shape index: {}]   ;;  %s4346_s11 = inlined_call_operand.hbm [shape: f32[1,64], index: 11, kind: input, shape index: {}]   ;;  %s4347_s12 = inlined_call_operand.<no memory space> [shape: f32[1,1], index: 12, kind: input, shape index: {}]   ;;  %s4348_s13 = inlined_call_operand.vmem [shape: f32[8,1], index: 13, kind: output, shape index: {}]  }
   0x1   :  { %v18_v0 = vstv %s4347_s12 }
   0x2   :  { %19 = vst [vmem:[#allocation3] sm:$0x1] %v18_v0 }
   0x3   :  { %20 = vsyncpa [#allocation5], 0 }
   0x4   :  { %21 = vsyncpa [#allocation7], 0 }
   0x5   :  { %22 = vsyncpa [#allocation10], 0 }
   0x6   :  { %23 = vsyncpa [#allocation13], 0  ;;  %s3615_s27 = smov [#allocation6]   ;;  %s3616_s29 = smov [#allocation9]  }
   0x7   :  { %s47_s28 = sshll.u32 %s3615_s27, 4  ;;  %s73_s30 = sshll.u32 %s3616_s29, 4  ;;  %s48_s28 = int_to_ptr.vmem [resolvable:$true] %s47_s28  ;;  %s3704_s30 = int_to_ptr.vmem [resolvable:$true] %s73_s30 }
   0x8   :  { %s3453_s16 = scalar_lea.hbm %s4339_s4, 2048 }
   0x9   :  { %p3454_p0 = scmp.ne.s32.totalorder %s4339_s4, %s3453_s16  ;;  %p3457_p1 = scmp.lt.u32.totalorder %s3453_s16, %s4339_s4 }
   0xb   :  { %p3459_p2 = pnand %p3457_p1, %p3454_p0 }
   0xd   :  { %3462 = shalt.err (!%p3459_p2)
}
   0xe   :  { %s3463_s20 = scalar_lea.vmem %s48_s28, 2048  ;;  %p3468_p4 = scmp.lt.s32.totalorder %s48_s28, %s48_s28 }
   0xf   :  { %p3464_p3 = scmp.ne.s32.totalorder %s48_s28, %s3463_s20  ;;  %p3469_p5 = scmp.lt.s32.totalorder %s3463_s20, %s3463_s20 }
  0x11   :  { %p3470_p6 = por %p3469_p5, %p3468_p4 }
  0x13   :  { %p3471_p7 = pnand %p3470_p6, %p3464_p3 }
  0x15   :  { %3474 = shalt.err (!%p3471_p7)
}
  0x16   :  { %s3617_s21 = smov 256   ;;  %s3618_s22 = smov 16  }
  0x17   :  { %53 = dma.hbm_to_vmem [thread:$0]  %s4339_s4, 2048, %s48_s28, [#allocation7], %s3617_s21, %s3617_s21, %s3618_s22  }
  0x18   :  { %s3475_s27 = scalar_lea.hbm %s4342_s7, 1024 }
  0x19   :  { %p3476_p8 = scmp.ne.s32.totalorder %s4342_s7, %s3475_s27  ;;  %p3479_p9 = scmp.lt.u32.totalorder %s3475_s27, %s4342_s7 }
  0x1b   :  { %p3481_p10 = pnand %p3479_p9, %p3476_p8 }
  0x1d   :  { %3484 = shalt.err (!%p3481_p10)
}
  0x1e   :  { %s3485_s17 = scalar_lea.vmem %s3704_s30, 1024  ;;  %p3490_p12 = scmp.lt.s32.totalorder %s3704_s30, %s3704_s30 }
  0x1f   :  { %p3486_p11 = scmp.ne.s32.totalorder %s3704_s30, %s3485_s17  ;;  %p3491_p13 = scmp.lt.s32.totalorder %s3485_s17, %s3485_s17 }
  0x21   :  { %p3492_p0 = por %p3491_p13, %p3490_p12 }
  0x23   :  { %p3493_p1 = pnand %p3492_p0, %p3486_p11 }
  0x25   :  { %3496 = shalt.err (!%p3493_p1)
}
  0x26   :  { %s3619_s4 = smov 128   ;;  %s3620_s28 = smov 8  }
  0x27   :  { %79 = dma.hbm_to_vmem [thread:$0]  %s4342_s7, 1024, %s3704_s30, [#allocation10], %s3619_s4, %s3619_s4, %s3620_s28  }
  0x28   :  { %s3621_s19 = smov [#allocation12]   ;;  %s3622_s23 = smov [#allocation4]  }
  0x29   :  { %s100_s20 = sshll.u32 %s3621_s19, 4  ;;  %s31_s24 = sshll.u32 %s3622_s23, 4  ;;  %s101_s20 = int_to_ptr.vmem [resolvable:$true] %s100_s20  ;;  %s3741_s24 = int_to_ptr.vmem [resolvable:$true] %s31_s24 }
  0x2a   :  { %s3497_s27 = scalar_lea.hbm %s4345_s10, 16 }
  0x2b   :  { %p3498_p2 = scmp.ne.s32.totalorder %s4345_s10, %s3497_s27  ;;  %p3501_p3 = scmp.lt.u32.totalorder %s3497_s27, %s4345_s10 }
  0x2d   :  { %p3503_p4 = pnand %p3501_p3, %p3498_p2 }
  0x2f   :  { %3506 = shalt.err (!%p3503_p4)
}
  0x30   :  { %s3507_s7 = scalar_lea.vmem %s101_s20, 16  ;;  %s3511_s30 = scalar_lea.vmem %s101_s20, 32 }
  0x31   :  { %p3508_p5 = scmp.ne.s32.totalorder %s101_s20, %s3507_s7  ;;  %p3512_p6 = scmp.lt.s32.totalorder %s101_s20, %s101_s20 }
  0x32   :  { %p3513_p7 = scmp.lt.s32.totalorder %s3511_s30, %s3507_s7 }
  0x34   :  { %p3514_p8 = por %p3513_p7, %p3512_p6 }
  0x36   :  { %p3515_p9 = pnand %p3514_p8, %p3508_p5 }
  0x38   :  { %3518 = shalt.err (!%p3515_p9)
}
  0x39   :  { %103 = dma.hbm_to_vmem [thread:$0]  %s4345_s10, 16, %s101_s20, [#allocation13]  }
  0x3a   :  { %s3519_s23 = scalar_lea.hbm %s4336_s1, 512 }
  0x3b   :  { %p3520_p10 = scmp.ne.s32.totalorder %s4336_s1, %s3519_s23  ;;  %p3523_p11 = scmp.lt.u32.totalorder %s3519_s23, %s4336_s1 }
  0x3d   :  { %p3525_p12 = pnand %p3523_p11, %p3520_p10 }
  0x3f   :  { %3528 = shalt.err (!%p3525_p12)
}
  0x40   :  { %s3529_s14 = scalar_lea.vmem %s3741_s24, 512  ;;  %p3534_p0 = scmp.lt.s32.totalorder %s3741_s24, %s3741_s24 }
  0x41   :  { %p3530_p13 = scmp.ne.s32.totalorder %s3741_s24, %s3529_s14  ;;  %p3535_p1 = scmp.lt.s32.totalorder %s3529_s14, %s3529_s14 }
  0x43   :  { %p3536_p2 = por %p3535_p1, %p3534_p0 }
  0x45   :  { %p3537_p3 = pnand %p3536_p2, %p3530_p13 }
  0x47   :  { %3540 = shalt.err (!%p3537_p3)
}
  0x48   :  { %37 = dma.hbm_to_vmem [thread:$0]  %s4336_s1, 512, %s3741_s24, [#allocation5], %s3617_s21, %s3617_s21, %s3618_s22  }
  0x49   :  { %s3623_s15 = smov [#allocation8]   ;;  %s3624_s7 = smov [#allocation11]  }
  0x4a   :  { %s59_s16 = sshll.u32 %s3623_s15, 4  ;;  %s87_s30 = sshll.u32 %s3624_s7, 4  ;;  %s60_s16 = int_to_ptr.vmem [resolvable:$true] %s59_s16  ;;  %s3775_s30 = int_to_ptr.vmem [resolvable:$true] %s87_s30 }
  0x4b   :  { %s3541_s12 = scalar_lea.hbm %s4340_s5, 2048 }
  0x4c   :  { %p3542_p4 = scmp.ne.s32.totalorder %s4340_s5, %s3541_s12  ;;  %p3545_p5 = scmp.lt.u32.totalorder %s3541_s12, %s4340_s5 }
  0x4e   :  { %p3547_p6 = pnand %p3545_p5, %p3542_p4 }
  0x50   :  { %3550 = shalt.err (!%p3547_p6)
}
  0x51   :  { %s3551_s1 = scalar_lea.vmem %s60_s16, 2048  ;;  %p3556_p8 = scmp.lt.s32.totalorder %s60_s16, %s60_s16 }
  0x52   :  { %p3552_p7 = scmp.ne.s32.totalorder %s60_s16, %s3551_s1  ;;  %p3557_p9 = scmp.lt.s32.totalorder %s3551_s1, %s3551_s1 }
  0x54   :  { %p3558_p10 = por %p3557_p9, %p3556_p8 }
  0x56   :  { %p3559_p11 = pnand %p3558_p10, %p3552_p7 }
  0x58   :  { %3562 = shalt.err (!%p3559_p11)
}
  0x59   :  { %65 = dma.hbm_to_vmem [thread:$0]  %s4340_s5, 2048, %s60_s16, [#allocation7], %s3617_s21, %s3617_s21, %s3618_s22  }
  0x5a   :  { %s3563_s10 = scalar_lea.hbm %s4344_s9, 1024 }
  0x5b   :  { %p3564_p12 = scmp.ne.s32.totalorder %s4344_s9, %s3563_s10  ;;  %p3567_p13 = scmp.lt.u32.totalorder %s3563_s10, %s4344_s9 }
  0x5d   :  { %p3569_p0 = pnand %p3567_p13, %p3564_p12 }
  0x5f   :  { %3572 = shalt.err (!%p3569_p0)
}
  0x60   :  { %s3573_s18 = scalar_lea.vmem %s3775_s30, 1024  ;;  %p3578_p2 = scmp.lt.s32.totalorder %s3775_s30, %s3775_s30 }
  0x61   :  { %p3574_p1 = scmp.ne.s32.totalorder %s3775_s30, %s3573_s18  ;;  %p3579_p3 = scmp.lt.s32.totalorder %s3573_s18, %s3573_s18 }
  0x63   :  { %p3580_p4 = por %p3579_p3, %p3578_p2 }
  0x65   :  { %p3581_p5 = pnand %p3580_p4, %p3574_p1 }
  0x67   :  { %3584 = shalt.err (!%p3581_p5)
}
  0x68   :  { %93 = dma.hbm_to_vmem [thread:$0]  %s4344_s9, 1024, %s3775_s30, [#allocation10], %s3619_s4, %s3619_s4, %s3620_s28  }
  0x69   :  { %s3625_s22 = smov [#allocation14]   ;;  %s3585_s23 = scalar_lea.hbm %s4346_s11, 16 }
  0x6a   :  { %s110_s16 = sshll.u32 %s3625_s22, 4  ;;  %p3586_p6 = scmp.ne.s32.totalorder %s4346_s11, %s3585_s23  ;;  %s111_s16 = int_to_ptr.vmem [resolvable:$true] %s110_s16 }
  0x6b   :  { %p3589_p7 = scmp.lt.u32.totalorder %s3585_s23, %s4346_s11 }
  0x6d   :  { %p3591_p8 = pnand %p3589_p7, %p3586_p6 }
  0x6f   :  { %3594 = shalt.err (!%p3591_p8)
}
  0x70   :  { %s3595_s27 = scalar_lea.vmem %s111_s16, 16  ;;  %s3599_s9 = scalar_lea.vmem %s111_s16, 32 }
  0x71   :  { %p3596_p9 = scmp.ne.s32.totalorder %s111_s16, %s3595_s27  ;;  %p3600_p10 = scmp.lt.s32.totalorder %s111_s16, %s111_s16 }
  0x72   :  { %p3601_p11 = scmp.lt.s32.totalorder %s3599_s9, %s3595_s27 }
  0x74   :  { %p3602_p12 = por %p3601_p11, %p3600_p10 }
  0x76   :  { %p3603_p13 = pnand %p3602_p12, %p3596_p9 }
  0x78   :  { %3606 = shalt.err (!%p3603_p13)
}
  0x79   :  { %113 = dma.hbm_to_vmem [thread:$0]  %s4346_s11, 16, %s111_s16, [#allocation13]  }
  0x7a   :  { %3607 = dma.done.wait [#allocation5], 512  }
  0x7b   :  { %3608 = vsyncadd [#allocation5], 4294966784 }
  0x7c   :  { %3609 = dma.done.wait [#allocation7], 4096  }
  0x7d   :  { %3610 = vsyncadd [#allocation7], 4294963200 }
  0x7e   :  { %3611 = dma.done.wait [#allocation10], 2048  }
  0x7f   :  { %3612 = vsyncadd [#allocation10], 4294965248 }
  0x80   :  { %3613 = dma.done.wait [#allocation13], 32  }
  0x81   :  { %3614 = vsyncadd [#allocation13], 4294967264  ;;  %v3626_v1 = vmov 0.0   ;;  %vm186_vm0 = vcmask 1041408   ;;  %vm3627_vm1 = vmmov 1   ;;  %v146_v2 = vld [vmem:[#allocation4 + $0x8] sm:$0xff]  ;;  %v151_v46 = vlaneseq }
  0x82   :  { %257 = vmatprep.mubr.f32.mxu0 %v3626_v1  ;;  %458 = vmatprep.mubr.f32.mxu1 %v3626_v1  ;;  %vm2804_vm2 = vmpackc.low %vm186_vm0, %vm3627_vm1  ;;  %v148_v3 = vld [vmem:[#allocation4 + $0x18] sm:$0x3]  ;;  %v145_v4 = vld [vmem:[#allocation4] sm:$0xff]  ;;  %vm161_vm3 = vcmask 80896   ;;  %vm390_vm4 = vcmask 523264   ;;  %vm3630_vm5 = vmmov 0  }
  0x83   :  { %v2803_v5 = vpack.c.bf16 %v148_v3, %v146_v2  ;;  %v147_v6 = vld [vmem:[#allocation4 + $0x10] sm:$0x3]  ;;  %v137_v8 = vld [vmem:[%s4335_s0] sm:$0xff]  ;;  %v375_v9 = vld [vmem:[#allocation8 + $0x8] sm:$0xff]  ;;  %v3898_v47 = vshrl.u32 %v151_v46, 7  ;;  %vm2667_vm8 = vcmask 7168  }
  0x84   :  { %v2806_v7 = vpack.c.bf16 %v147_v6, %v145_v4  ;;  %v377_v10 = vld [vmem:[#allocation8 + $0x18] sm:$0xff]  ;;  %v374_v11 = vld [vmem:[#allocation8] sm:$0xff]  ;;  %v376_v13 = vld [vmem:[#allocation8 + $0x10] sm:$0xff] }
  0x85   :  { %2805 = vmatprep.subr.msk.bf16.mxu0 %vm2804_vm2, %v2803_v5  ;;  %v3831_v12 = vpack.c.bf16 %v377_v10, %v375_v9  ;;  %v138_v14 = vld [vmem:[%s4335_s0 + $0x8] sm:$0xff]  ;;  %v3836_v16 = vpack.c.bf16 %v376_v13, %v374_v11  ;;  %v381_v17 = vld [vmem:[#allocation8 + $0x38] sm:$0xff]  ;;  %v380_v19 = vld [vmem:[#allocation8 + $0x30] sm:$0xff]  ;;  %v153_v48 = vsub.s32 0, %v3898_v47  ;;  %v157_v55 = vsub.s32 1, %v3898_v47 }
  0x86   :  { %2808 = vmatpush1.bf16.msk.msra.mxu0 %vm2804_vm2, %v2806_v7  ;;  %v379_v15 = vld [vmem:[#allocation8 + $0x28] sm:$0xff]  ;;  %v378_v18 = vld [vmem:[#allocation8 + $0x20] sm:$0xff]  ;;  %v385_v23 = vld [vmem:[#allocation8 + $0x58] sm:$0xff] }
  0x87   :  { %2810 = vmatprep.subr.bf16.mxu1 %v3831_v12  ;;  %v3840_v20 = vpack.c.bf16 %v381_v17, %v379_v15  ;;  %v139_v21 = vld [vmem:[%s4335_s0 + $0x10] sm:$0xff]  ;;  %v3847_v24 = vpack.c.bf16 %v380_v19, %v378_v18  ;;  %v382_v26 = vld [vmem:[#allocation8 + $0x40] sm:$0xff]  ;;  %v389_v29 = vld [vmem:[#allocation8 + $0x78] sm:$0xff] }
  0x88   :  { %v383_v22 = vld [vmem:[#allocation8 + $0x48] sm:$0xff]  ;;  %2812 = vmatpush1.bf16.msra.mxu1 %v3836_v16  ;;  %v384_v27 = vld [vmem:[#allocation8 + $0x50] sm:$0xff]  ;;  %v565_v34 = vld [vmem:[%s4338_s3] sm:$0xff] }
  0x89   :  { %2679 = vmatmul.mubr.msk.f32.vlgmr.msra.gmra.mrb[0].mxu0 %vm161_vm3, %v137_v8  ;;  %2814 = vmatprep.subr.bf16.mxu1 %v3840_v20  ;;  %v3850_v25 = vpack.c.bf16 %v385_v23, %v383_v22  ;;  %v387_v28 = vld [vmem:[#allocation8 + $0x68] sm:$0xff]  ;;  %v568_v31 = vld [vmem:[%s4338_s3 + $0x18] sm:$0xff]  ;;  %v3872_v36 = vpack.c.bf16 %v384_v27, %v382_v26  ;;  %v386_v39 = vld [vmem:[#allocation8 + $0x60] sm:$0xff] }
  0x8a   :  { %263 = vmatprep.mubr.f32.mxu0 %v3626_v1  ;;  %v566_v30 = vld [vmem:[%s4338_s3 + $0x8] sm:$0xff]  ;;  %v140_v32 = vld [vmem:[%s4335_s0 + $0x18] sm:$0xff]  ;;  %v567_v35 = vld [vmem:[%s4338_s3 + $0x10] sm:$0xff]  ;;  %v3877_v38 = vpack.c.bf16 %v389_v29, %v387_v28 }
  0x8b   :  { %v3863_v33 = vpack.c.bf16 %v568_v31, %v566_v30  ;;  %v3874_v37 = vpack.c.bf16 %v567_v35, %v565_v34  ;;  %v388_v40 = vld [vmem:[#allocation8 + $0x70] sm:$0xff]  ;;  %v359_v41 = vld [vmem:[#allocation6 + $0x8] sm:$0xff]  ;;  %v361_v42 = vld [vmem:[#allocation6 + $0x18] sm:$0xff] }
  0x8c   :  { %2816 = vmatpush1.bf16.msra.mxu1 %v3847_v24  ;;  %v141_v43 = vld [vmem:[%s4335_s0 + $0x20] sm:$0xff]  ;;  %v3887_v44 = vpack.c.bf16 %v388_v40, %v386_v39  ;;  %v3890_v45 = vpack.c.bf16 %v361_v42, %v359_v41  ;;  %v360_v60 = vld [vmem:[#allocation6 + $0x10] sm:$0xff]  ;;  %v363_v63 = vld [vmem:[#allocation6 + $0x28] sm:$0xff] }
  0x8d   :  { %2680 = vmatmul.mubr.msk.f32.gmra.mrb[2].mxu0 %vm161_vm3, %v138_v14  ;;  %2818 = vmatprep.subr.bf16.mxu1 %v3850_v25  ;;  %v149_v49 = vld [vmem:[%s4337_s2] sm:$0x3]  ;;  %v570_v2 = vld [vmem:[%s4338_s3 + $0x28] sm:$0xff]  ;;  %v572_v4 = vld [vmem:[%s4338_s3 + $0x38] sm:$0xff] }
  0x8e   :  { %269 = vmatprep.mubr.f32.mxu0 %v3626_v1  ;;  %2842 = vmatprep.subr.bf16.mxu0 %v3863_v33  ;;  %v3906_v50 = vrot.slane %v149_v49, %v153_v48  ;;  %v3912_v56 = vrot.slane %v149_v49, %v157_v55  ;;  %v358_v59 = vld [vmem:[#allocation6] sm:$0xff]  ;;  %v365_v0 = vld [vmem:[#allocation6 + $0x38] sm:$0xff]  ;;  %v364_v6 = vld [vmem:[#allocation6 + $0x30] sm:$0xff]  ;;  %v3932_v8 = vpack.c.bf16 %v572_v4, %v570_v2 }
  0x8f   :  { %2844 = vmatpush1.bf16.msra.mxu0 %v3874_v37  ;;  %v3917_v62 = vpack.c.bf16 %v360_v60, %v358_v59  ;;  %v3924_v3 = vpack.c.bf16 %v365_v0, %v363_v63  ;;  %v362_v5 = vld [vmem:[#allocation6 + $0x20] sm:$0xff]  ;;  %v571_v11 = vld [vmem:[%s4338_s3 + $0x30] sm:$0xff]  ;;  %v369_v17 = vld [vmem:[#allocation6 + $0x58] sm:$0xff] }
  0x90   :  { %2820 = vmatpush1.bf16.msra.mxu1 %v3872_v36  ;;  %v142_v7 = vld [vmem:[%s4335_s0 + $0x28] sm:$0xff]  ;;  %v3934_v9 = vpack.c.bf16 %v364_v6, %v362_v5  ;;  %v569_v10 = vld [vmem:[%s4338_s3 + $0x20] sm:$0xff]  ;;  %v143_v14 = vld [vmem:[%s4335_s0 + $0x30] sm:$0xff]  ;;  %2846 = vmatprep.subr.bf16.mxu0 %v3932_v8 }
  0x91   :  { %2681 = vmatmul.mubr.msk.f32.gmra.mrb[4].mxu0 %vm161_vm3, %v139_v21  ;;  %2822 = vmatprep.subr.bf16.mxu1 %v3877_v38  ;;  %v3944_v13 = vpack.c.bf16 %v571_v11, %v569_v10  ;;  %v367_v15 = vld [vmem:[#allocation6 + $0x48] sm:$0xff]  ;;  %v576_v21 = vld [vmem:[%s4338_s3 + $0x58] sm:$0xff]  ;;  %v366_v22 = vld [vmem:[#allocation6 + $0x40] sm:$0xff] }
  0x92   :  { %275 = vmatprep.mubr.f32.mxu0 %v3626_v1  ;;  %v3951_v18 = vpack.c.bf16 %v369_v17, %v367_v15  ;;  %v574_v19 = vld [vmem:[%s4338_s3 + $0x48] sm:$0xff]  ;;  %v368_v26 = vld [vmem:[#allocation6 + $0x50] sm:$0xff]  ;;  %v573_v27 = vld [vmem:[%s4338_s3 + $0x40] sm:$0xff] }
  0x93   :  { %2848 = vmatpush1.bf16.msra.mxu0 %v3944_v13  ;;  %v3961_v23 = vpack.c.bf16 %v576_v21, %v574_v19  ;;  %v575_v28 = vld [vmem:[%s4338_s3 + $0x50] sm:$0xff]  ;;  %v3970_v29 = vpack.c.bf16 %v368_v26, %v366_v22  ;;  %v144_v31 = vld [vmem:[%s4335_s0 + $0x38] sm:$0xff]  ;;  %v578_v39 = vld [vmem:[%s4338_s3 + $0x68] sm:$0xff] }
  0x94   :  { %2824 = vmatpush1.bf16.msra.mxu1 %v3887_v44  ;;  %v3972_v30 = vpack.c.bf16 %v575_v28, %v573_v27  ;;  %v373_v34 = vld [vmem:[#allocation6 + $0x78] sm:$0xff]  ;;  %v370_v41 = vld [vmem:[#allocation6 + $0x60] sm:$0xff]  ;;  %v579_v49 = vld [vmem:[%s4338_s3 + $0x70] sm:$0xff] }
  0x95   :  { %2682 = vmatmul.mubr.msk.f32.gmra.mrb[6].mxu0 %vm161_vm3, %v140_v32  ;;  %2826 = vmatprep.subr.bf16.mxu1 %v3890_v45  ;;  %v371_v32 = vld [vmem:[#allocation6 + $0x68] sm:$0xff]  ;;  %v580_v40 = vld [vmem:[%s4338_s3 + $0x78] sm:$0xff]  ;;  %v577_v46 = vld [vmem:[%s4338_s3 + $0x60] sm:$0xff]  ;;  %s3628_s3 = smov 64  }
  0x96   :  { %281 = vmatprep.mubr.f32.mxu0 %v3626_v1  ;;  %2850 = vmatprep.subr.bf16.mxu0 %v3961_v23  ;;  %v3979_v35 = vpack.c.bf16 %v373_v34, %v371_v32  ;;  %v3989_v42 = vpack.c.bf16 %v580_v40, %v578_v39 }
  0x97   :  { %459 = vmatmul.mubr.f32.vlgmr.msra.gmra.mrb[0].mxu1 %v3626_v1  ;;  %2852 = vmatpush1.bf16.msra.mxu0 %v3972_v30 }
  0x98   :  { %532 = vmatprep.mubr.f32.mxu1 %v3626_v1  ;;  %2828 = vmatpush1.bf16.msra.mxu1 %v3917_v62 }
  0x99   :  { %2683 = vmatmul.mubr.msk.f32.gmra.mrb[8].mxu0 %vm161_vm3, %v141_v43  ;;  %2830 = vmatprep.subr.bf16.mxu1 %v3924_v3  ;;  %v372_v43 = vld [vmem:[#allocation6 + $0x70] sm:$0xff] }
  0x9a   :  { %287 = vmatprep.mubr.f32.mxu0 %v3626_v1  ;;  %2854 = vmatprep.subr.bf16.mxu0 %v3989_v42 }
  0x9c   :  { %2832 = vmatpush1.bf16.msra.mxu1 %v3934_v9 }
  0x9d   :  { %2684 = vmatmul.mubr.msk.f32.gmra.mrb[10].mxu0 %vm161_vm3, %v142_v7  ;;  %2834 = vmatprep.subr.bf16.mxu1 %v3951_v18 }
  0x9e   :  { %293 = vmatprep.mubr.f32.mxu0 %v3626_v1 }
  0xa0   :  { %2836 = vmatpush1.bf16.msra.mxu1 %v3970_v29 }
  0xa1   :  { %2685 = vmatmul.mubr.msk.f32.gmra.mrb[12].mxu0 %vm161_vm3, %v143_v14  ;;  %2838 = vmatprep.subr.bf16.mxu1 %v3979_v35 }
  0xa2   :  { %299 = vmatprep.mubr.f32.mxu0 %v3626_v1 }
  0xa5   :  { %2686 = vmatmul.mubr.msk.f32.gmra.mrb[14].mxu0 %vm161_vm3, %v144_v31 }
  0xa6   :  { %645 = vmatprep.mubr.f32.mxu0 %v3626_v1 }
 0x15c   :  { %v259_v51 = vpop.f32.mrb[0].mxu0 }
 0x15d   :  { %v260_v52 = vadd.f32 %v259_v51, %v3906_v50  ;;  %v261_v53 = vpop.f32.mrb[1].mxu0 }
 0x15e   :  { %v3915_v57 = vadd.f32 %v261_v53, %v3912_v56  ;;  %v4001_v53 = vpack.c.bf16 %v579_v49, %v577_v46 }
 0x15f   :  { %v2687_v54 = vmul.f32 -1.442695, %v260_v52  ;;  %v3999_v52 = vpack.c.bf16 %v372_v43, %v370_v41 }
 0x160   :  { %2856 = vmatpush1.bf16.msra.mxu0 %v4001_v53  ;;  %v2688_v59 = vmul.f32 -1.442695, %v3915_v57 }
 0x161   :  { %3261 = vpow2.f32 %v2687_v54  ;;  %2840 = vmatpush1.bf16.msra.mxu1 %v3999_v52  ;;  %2890 = vmatprep.subr.bf16.mxu0 %v3863_v33 }
 0x162   :  { %3263 = vtanh.f32 %v3915_v57  ;;  %2858 = vmatprep.subr.bf16.mxu1 %v3831_v12  ;;  %v322_v57 = vld [vmem:[%s4341_s6] sm:$0x3] }
 0x163   :  { %v4040_v7 = vrot.slane %v322_v57, %v153_v48  ;;  %v4046_v26 = vrot.slane %v322_v57, %v157_v55 }
 0x16b   :  { %v3262_v58 = vpop.eup %3261 }
 0x16c   :  { %v342_v61 = vadd.f32 1.0, %v3262_v58  ;;  %v3264_v51 = vpop.eup %3263 }
 0x16e   :  { %3265 = vrcp.f32 %v342_v61 }
 0x16f   :  { %3267 = vpow2.f32 %v2688_v59 }
 0x178   :  { %v3266_v54 = vpop.eup %3265 }
 0x179   :  { %v350_v58 = vmul.f32 %v3266_v54, %v3264_v51  ;;  %v3268_v60 = vpop.eup %3267  ;;  %v349_v63 = vmul.f32 0.0, %v3266_v54 }
 0x17a   :  { %v343_v61 = vadd.f32 1.0, %v3268_v60 }
 0x17b   :  { %352 = vrot.lane.b32.xlu0 %v350_v58, %s3628_s3 }
 0x17c   :  { %3269 = vrcp.f32 %v343_v61 }
 0x186   :  { %v3270_v4 = vpop.eup %3269 }
 0x1ed   :  { %v353_v0 = vpop.permute.xlu0 %352 }
 0x1ee   :  { %v4012_v2 = vadd.f32 %v353_v0, %v349_v63 }
 0x1f0   :  { %3271 = vtanh.f32 %v4012_v2 }
 0x1fa   :  { %v3272_v5 = vpop.eup %3271 }
 0x1fb   :  { %v357_v6 = vmul.f32 %v3272_v5, %v3270_v4 }
 0x1fd   :  { %2689 = vmatmul.mubr.msk.f32.vlgmr.msra.gmra.mrb[0].mxu1 %vm390_vm4, %v357_v6  ;;  %2692 = vmatmul.mubr.msk.f32.vlgmr.msra.gmra.mrb[2].mxu0 %vm390_vm4, %v357_v6 }
 0x1fe   :  { %2860 = vmatpush1.bf16.msra.mxu1 %v3836_v16  ;;  %2892 = vmatpush1.bf16.msra.mxu0 %v3874_v37 }
 0x1ff   :  { %2862 = vmatprep.subr.bf16.mxu1 %v3840_v20  ;;  %2894 = vmatprep.subr.bf16.mxu0 %v3932_v8 }
 0x200   :  { %743 = vmatprep.mubr.f32.mxu1 %v3626_v1  ;;  %914 = vmatprep.mubr.f32.mxu0 %v3626_v1 }
 0x202   :  { %2864 = vmatpush1.bf16.msra.mxu1 %v3847_v24  ;;  %2896 = vmatpush1.bf16.msra.mxu0 %v3944_v13 }
 0x203   :  { %2866 = vmatprep.subr.bf16.mxu1 %v3850_v25  ;;  %2898 = vmatprep.subr.bf16.mxu0 %v3961_v23 }
 0x206   :  { %2868 = vmatpush1.bf16.msra.mxu1 %v3872_v36  ;;  %2900 = vmatpush1.bf16.msra.mxu0 %v3972_v30 }
 0x207   :  { %2870 = vmatprep.subr.bf16.mxu1 %v3877_v38  ;;  %2902 = vmatprep.subr.bf16.mxu0 %v3989_v42 }
 0x20a   :  { %2872 = vmatpush1.bf16.msra.mxu1 %v3887_v44  ;;  %2904 = vmatpush1.bf16.msra.mxu0 %v4001_v53 }
 0x20b   :  { %2874 = vmatprep.subr.bf16.mxu1 %v3890_v45  ;;  %2906 = vmatprep.subr.bf16.mxu0 %v3831_v12 }
 0x2d0   :  { %v534_v10 = vpop.f32.mrb[0].mxu1  ;;  %v647_v11 = vpop.f32.mrb[2].mxu0 }
 0x2d1   :  { %v539_v14 = vadd.f32 %v534_v10, %v4040_v7  ;;  %v3201_v15 = vadd.f32 %v647_v11, %v3906_v50  ;;  %v536_v17 = vpop.f32.mrb[1].mxu1  ;;  %v649_v19 = vpop.f32.mrb[3].mxu0 }
 0x2d2   :  { %v540_v27 = vadd.f32 %v536_v17, %v4046_v26  ;;  %v3202_v48 = vadd.f32 %v649_v19, %v3912_v56 }
 0x2d3   :  { %v2690_v21 = vmul.f32 -1.442695, %v539_v14  ;;  %v2693_v22 = vmul.f32 -1.442695, %v3201_v15 }
 0x2d4   :  { %v2691_v55 = vmul.f32 -1.442695, %v540_v27  ;;  %v2694_v49 = vmul.f32 -1.442695, %v3202_v48 }
 0x2d5   :  { %3273 = vpow2.f32 %v2690_v21 }
 0x2d6   :  { %3275 = vpow2.f32 %v2693_v22 }
 0x2d7   :  { %3277 = vtanh.f32 %v540_v27 }
 0x2d8   :  { %3279 = vtanh.f32 %v3202_v48 }
 0x2df   :  { %v3274_v28 = vpop.eup %3273 }
 0x2e0   :  { %v3276_v31 = vpop.eup %3275  ;;  %v547_v32 = vadd.f32 1.0, %v3274_v28 }
 0x2e1   :  { %v660_v34 = vadd.f32 1.0, %v3276_v31  ;;  %v3278_v39 = vpop.eup %3277 }
 0x2e2   :  { %3281 = vrcp.f32 %v547_v32  ;;  %v3280_v40 = vpop.eup %3279 }
 0x2e3   :  { %3283 = vrcp.f32 %v660_v34 }
 0x2e4   :  { %3285 = vpow2.f32 %v2691_v55 }
 0x2e5   :  { %3287 = vpow2.f32 %v2694_v49 }
 0x2ec   :  { %v3282_v41 = vpop.eup %3281 }
 0x2ed   :  { %v3284_v43 = vpop.eup %3283  ;;  %v555_v46 = vmul.f32 %v3282_v41, %v3278_v39  ;;  %v554_v60 = vmul.f32 0.0, %v3282_v41 }
 0x2ee   :  { %v668_v47 = vmul.f32 %v3284_v43, %v3280_v40  ;;  %v3286_v51 = vpop.eup %3285  ;;  %v667_v61 = vmul.f32 %v3284_v43, %v4012_v2 }
 0x2ef   :  { %557 = vrot.lane.b32.xlu0 %v555_v46, %s3628_s3  ;;  %v3288_v54 = vpop.eup %3287  ;;  %v548_v58 = vadd.f32 1.0, %v3286_v51 }
 0x2f0   :  { %670 = vrot.lane.b32.xlu1 %v668_v47, %s3628_s3  ;;  %v661_v59 = vadd.f32 1.0, %v3288_v54 }
 0x2f1   :  { %3289 = vrcp.f32 %v548_v58 }
 0x2f2   :  { %3291 = vrcp.f32 %v661_v59 }
 0x2fb   :  { %v3290_v6 = vpop.eup %3289 }
 0x2fc   :  { %v3292_v57 = vpop.eup %3291 }
 0x361   :  { %v558_v63 = vpop.permute.xlu0 %557 }
 0x362   :  { %v671_v0 = vpop.permute.xlu1 %670  ;;  %v4053_v4 = vadd.f32 %v558_v63, %v554_v60 }
 0x363   :  { %v4055_v5 = vadd.f32 %v671_v0, %v667_v61 }
 0x364   :  { %3293 = vtanh.f32 %v4053_v4 }
 0x365   :  { %3295 = vtanh.f32 %v4055_v5 }
 0x36e   :  { %v3294_v10 = vpop.eup %3293 }
 0x36f   :  { %v3296_v11 = vpop.eup %3295  ;;  %v562_v14 = vmul.f32 %v3294_v10, %v3290_v6 }
 0x370   :  { %v675_v15 = vmul.f32 %v3296_v11, %v3292_v57 }
 0x371   :  { %2695 = vmatmul.mubr.msk.f32.vlgmr.msra.gmra.mrb[2].mxu1 %vm390_vm4, %v562_v14 }
 0x372   :  { %2876 = vmatpush1.bf16.msra.mxu1 %v3917_v62  ;;  %2699 = vmatmul.mubr.msk.f32.vlgmr.msra.gmra.mrb[4].mxu0 %vm390_vm4, %v675_v15 }
 0x373   :  { %2878 = vmatprep.subr.bf16.mxu1 %v3924_v3  ;;  %817 = vmatprep.mubr.f32.mxu1 %v3626_v1 }
 0x374   :  { %2908 = vmatpush1.bf16.msra.mxu0 %v3836_v16  ;;  %1012 = vmatprep.mubr.f32.mxu0 %v3626_v1 }
 0x375   :  { %2910 = vmatprep.subr.bf16.mxu0 %v3840_v20 }
 0x376   :  { %2880 = vmatpush1.bf16.msra.mxu1 %v3934_v9 }
 0x377   :  { %2882 = vmatprep.subr.bf16.mxu1 %v3951_v18 }
 0x378   :  { %2912 = vmatpush1.bf16.msra.mxu0 %v3847_v24 }
 0x379   :  { %2914 = vmatprep.subr.bf16.mxu0 %v3850_v25 }
 0x37a   :  { %2884 = vmatpush1.bf16.msra.mxu1 %v3970_v29 }
 0x37b   :  { %2886 = vmatprep.subr.bf16.mxu1 %v3979_v35 }
 0x37c   :  { %2916 = vmatpush1.bf16.msra.mxu0 %v3872_v36 }
 0x37d   :  { %2918 = vmatprep.subr.bf16.mxu0 %v3877_v38 }
 0x37e   :  { %2888 = vmatpush1.bf16.msra.mxu1 %v3999_v52 }
 0x37f   :  { %2954 = vmatprep.subr.bf16.mxu1 %v3831_v12 }
 0x380   :  { %2920 = vmatpush1.bf16.msra.mxu0 %v3887_v44 }
 0x381   :  { %2696 = vmatmul.mubr.msk.f32.vlgmr.msra.gmra.mrb[2].mxu1 %vm390_vm4, %v675_v15  ;;  %2922 = vmatprep.subr.bf16.mxu0 %v3890_v45 }
 0x382   :  { %2956 = vmatpush1.bf16.msra.mxu1 %v3836_v16  ;;  %1281 = vmatprep.mubr.f32.mxu1 %v3626_v1 }
 0x383   :  { %2958 = vmatprep.subr.bf16.mxu1 %v3840_v20 }
 0x386   :  { %2960 = vmatpush1.bf16.msra.mxu1 %v3847_v24 }
 0x387   :  { %2962 = vmatprep.subr.bf16.mxu1 %v3850_v25 }
 0x38a   :  { %2964 = vmatpush1.bf16.msra.mxu1 %v3872_v36 }
 0x38b   :  { %2966 = vmatprep.subr.bf16.mxu1 %v3877_v38 }
 0x38e   :  { %2968 = vmatpush1.bf16.msra.mxu1 %v3887_v44 }
 0x38f   :  { %2970 = vmatprep.subr.bf16.mxu1 %v3890_v45 }
 0x445   :  { %v916_v2 = vpop.f32.mrb[4].mxu0 }
 0x446   :  { %v3203_v17 = vadd.f32 %v916_v2, %v3906_v50  ;;  %v918_v19 = vpop.f32.mrb[5].mxu0 }
 0x447   :  { %v3204_v22 = vadd.f32 %v918_v19, %v3912_v56 }
 0x448   :  { %v2700_v21 = vmul.f32 -1.442695, %v3203_v17 }
 0x449   :  { %v2701_v59 = vmul.f32 -1.442695, %v3204_v22 }
 0x44a   :  { %3297 = vpow2.f32 %v2700_v21 }
 0x44b   :  { %3299 = vtanh.f32 %v3204_v22 }
 0x454   :  { %v3298_v27 = vpop.eup %3297  ;;  %v819_v48 = vpop.f32.mrb[2].mxu1 }
 0x455   :  { %v929_v28 = vadd.f32 1.0, %v3298_v27  ;;  %v824_v31 = vadd.f32 %v819_v48, %v4040_v7  ;;  %v821_v32 = vpop.f32.mrb[3].mxu1  ;;  %v3300_v39 = vpop.eup %3299 }
 0x456   :  { %v825_v41 = vadd.f32 %v821_v32, %v4046_v26 }
 0x457   :  { %3301 = vrcp.f32 %v929_v28  ;;  %v2697_v34 = vmul.f32 -1.442695, %v824_v31 }
 0x458   :  { %v2698_v54 = vmul.f32 -1.442695, %v825_v41 }
 0x459   :  { %3303 = vpow2.f32 %v2697_v34 }
 0x45a   :  { %3305 = vtanh.f32 %v825_v41 }
 0x461   :  { %v3302_v40 = vpop.eup %3301 }
 0x462   :  { %v937_v43 = vmul.f32 %v3302_v40, %v3300_v39  ;;  %v936_v10 = vmul.f32 %v3302_v40, %v4055_v5 }
 0x463   :  { %v3304_v46 = vpop.eup %3303 }
 0x464   :  { %v832_v47 = vadd.f32 1.0, %v3304_v46  ;;  %939 = vrot.lane.b32.xlu0 %v937_v43, %s3628_s3  ;;  %v3306_v55 = vpop.eup %3305 }
 0x466   :  { %3307 = vrcp.f32 %v832_v47 }
 0x467   :  { %3309 = vpow2.f32 %v2698_v54 }
 0x468   :  { %3311 = vpow2.f32 %v2701_v59 }
 0x470   :  { %v3308_v49 = vpop.eup %3307 }
 0x471   :  { %v840_v51 = vmul.f32 %v3308_v49, %v3306_v55  ;;  %v3310_v58 = vpop.eup %3309  ;;  %v839_v61 = vmul.f32 %v3308_v49, %v4053_v4 }
 0x472   :  { %v833_v60 = vadd.f32 1.0, %v3310_v58  ;;  %v3312_v57 = vpop.eup %3311 }
 0x473   :  { %842 = vrot.lane.b32.xlu1 %v840_v51, %s3628_s3  ;;  %v930_v17 = vadd.f32 1.0, %v3312_v57 }
 0x474   :  { %3313 = vrcp.f32 %v833_v60 }
 0x47e   :  { %v3314_v11 = vpop.eup %3313 }
 0x4d6   :  { %v940_v6 = vpop.permute.xlu0 %939 }
 0x4d7   :  { %v4100_v15 = vadd.f32 %v940_v6, %v936_v10 }
 0x4e5   :  { %v843_v63 = vpop.permute.xlu1 %842 }
 0x4e6   :  { %v4096_v0 = vadd.f32 %v843_v63, %v839_v61 }
 0x4e8   :  { %3315 = vtanh.f32 %v4096_v0 }
 0x4e9   :  { %3317 = vtanh.f32 %v4100_v15 }
 0x4ea   :  { %3319 = vrcp.f32 %v930_v17 }
 0x4f2   :  { %v3316_v14 = vpop.eup %3315 }
 0x4f3   :  { %v847_v2 = vmul.f32 %v3316_v14, %v3314_v11  ;;  %v3318_v4 = vpop.eup %3317 }
 0x4f4   :  { %v3320_v5 = vpop.eup %3319 }
 0x4f5   :  { %2702 = vmatmul.mubr.msk.f32.vlgmr.msra.gmra.mrb[16].mxu0 %vm390_vm4, %v847_v2  ;;  %v944_v19 = vmul.f32 %v3320_v5, %v3318_v4 }
 0x4f6   :  { %2924 = vmatpush1.bf16.msra.mxu0 %v3917_v62  ;;  %1086 = vmatprep.mubr.f32.mxu0 %v3626_v1 }
 0x4f7   :  { %2926 = vmatprep.subr.bf16.mxu0 %v3924_v3 }
 0x4fa   :  { %2928 = vmatpush1.bf16.msra.mxu0 %v3934_v9 }
 0x4fb   :  { %2930 = vmatprep.subr.bf16.mxu0 %v3951_v18 }
 0x4fe   :  { %2932 = vmatpush1.bf16.msra.mxu0 %v3970_v29 }
 0x4ff   :  { %2934 = vmatprep.subr.bf16.mxu0 %v3979_v35 }
 0x502   :  { %2936 = vmatpush1.bf16.msra.mxu0 %v3999_v52 }
 0x503   :  { %2938 = vmatprep.subr.bf16.mxu0 %v3863_v33 }
 0x505   :  { %2703 = vmatmul.mubr.msk.f32.vlgmr.msra.gmra.mrb[16].mxu0 %vm390_vm4, %v944_v19 }
 0x506   :  { %2940 = vmatpush1.bf16.msra.mxu0 %v3874_v37  ;;  %1183 = vmatprep.mubr.f32.mxu0 %v3626_v1 }
 0x507   :  { %2942 = vmatprep.subr.bf16.mxu0 %v3932_v8 }
 0x50a   :  { %2944 = vmatpush1.bf16.msra.mxu0 %v3944_v13 }
 0x50b   :  { %2946 = vmatprep.subr.bf16.mxu0 %v3961_v23 }
 0x50e   :  { %2948 = vmatpush1.bf16.msra.mxu0 %v3972_v30 }
 0x50f   :  { %2950 = vmatprep.subr.bf16.mxu0 %v3989_v42 }
 0x512   :  { %2952 = vmatpush1.bf16.msra.mxu0 %v4001_v53 }
 0x513   :  { %2986 = vmatprep.subr.bf16.mxu0 %v3863_v33 }
 0x515   :  { %2706 = vmatmul.mubr.msk.f32.vlgmr.msra.gmra.mrb[6].mxu0 %vm390_vm4, %v944_v19 }
 0x516   :  { %2988 = vmatpush1.bf16.msra.mxu0 %v3874_v37  ;;  %1452 = vmatprep.mubr.f32.mxu0 %v3626_v1 }
 0x517   :  { %2990 = vmatprep.subr.bf16.mxu0 %v3932_v8 }
 0x51a   :  { %2992 = vmatpush1.bf16.msra.mxu0 %v3944_v13 }
 0x51b   :  { %2994 = vmatprep.subr.bf16.mxu0 %v3961_v23 }
 0x51e   :  { %2996 = vmatpush1.bf16.msra.mxu0 %v3972_v30 }
 0x51f   :  { %2998 = vmatprep.subr.bf16.mxu0 %v3989_v42 }
 0x522   :  { %3000 = vmatpush1.bf16.msra.mxu0 %v4001_v53 }
 0x523   :  { %3034 = vmatprep.subr.bf16.mxu0 %v3863_v33 }
 0x5d8   :  { %v1088_v21 = vpop.f32.mrb[16].mxu0 }
 0x5d9   :  { %v1093_v22 = vadd.f32 %v1088_v21, %v4040_v7  ;;  %v1090_v27 = vpop.f32.mrb[17].mxu0 }
 0x5da   :  { %v1094_v28 = vadd.f32 %v1090_v27, %v4046_v26 }
 0x5db   :  { %v2704_v48 = vmul.f32 -1.442695, %v1093_v22 }
 0x5dc   :  { %v2705_v60 = vmul.f32 -1.442695, %v1094_v28 }
 0x5dd   :  { %3321 = vpow2.f32 %v2704_v48 }
 0x5de   :  { %3323 = vtanh.f32 %v1094_v28 }
 0x5e7   :  { %v3322_v31 = vpop.eup %3321 }
 0x5e8   :  { %v1101_v32 = vadd.f32 1.0, %v3322_v31  ;;  %v1185_v34 = vpop.f32.mrb[6].mxu0  ;;  %v3324_v43 = vpop.eup %3323 }
 0x5e9   :  { %v3205_v39 = vadd.f32 %v1185_v34, %v3906_v50  ;;  %v1187_v40 = vpop.f32.mrb[7].mxu0 }
 0x5ea   :  { %3325 = vrcp.f32 %v1101_v32  ;;  %v3206_v47 = vadd.f32 %v1187_v40, %v3912_v56 }
 0x5eb   :  { %v2707_v41 = vmul.f32 -1.442695, %v3205_v39 }
 0x5ec   :  { %v2708_v63 = vmul.f32 -1.442695, %v3206_v47 }
 0x5ed   :  { %3327 = vpow2.f32 %v2707_v41 }
 0x5ee   :  { %3329 = vtanh.f32 %v3206_v47 }
 0x5f4   :  { %v3326_v46 = vpop.eup %3325 }
 0x5f5   :  { %v1109_v55 = vmul.f32 %v3326_v46, %v3324_v43  ;;  %v1108_v57 = vmul.f32 %v3326_v46, %v4096_v0 }
 0x5f7   :  { %v3328_v49 = vpop.eup %3327  ;;  %1111 = vrot.lane.b32.xlu1 %v1109_v55, %s3628_s3 }
 0x5f8   :  { %v1198_v51 = vadd.f32 1.0, %v3328_v49  ;;  %v3330_v54 = vpop.eup %3329 }
 0x5fa   :  { %3331 = vrcp.f32 %v1198_v51 }
 0x5fb   :  { %3333 = vpow2.f32 %v2705_v60 }
 0x5fc   :  { %3335 = vpow2.f32 %v2708_v63 }
 0x604   :  { %v3332_v58 = vpop.eup %3331 }
 0x605   :  { %v1206_v59 = vmul.f32 %v3332_v58, %v3330_v54  ;;  %v3334_v61 = vpop.eup %3333  ;;  %v1205_v19 = vmul.f32 %v3332_v58, %v4100_v15 }
 0x606   :  { %v1102_v6 = vadd.f32 1.0, %v3334_v61  ;;  %v3336_v14 = vpop.eup %3335 }
 0x607   :  { %1208 = vrot.lane.b32.xlu0 %v1206_v59, %s3628_s3  ;;  %v1199_v4 = vadd.f32 1.0, %v3336_v14 }
 0x608   :  { %3337 = vrcp.f32 %v1102_v6 }
 0x612   :  { %v3338_v2 = vpop.eup %3337 }
 0x669   :  { %v1112_v10 = vpop.permute.xlu1 %1111 }
 0x66a   :  { %v4140_v11 = vadd.f32 %v1112_v10, %v1108_v57 }
 0x66c   :  { %3339 = vtanh.f32 %v4140_v11 }
 0x66d   :  { %3341 = vrcp.f32 %v1199_v4 }
 0x676   :  { %v3340_v17 = vpop.eup %3339 }
 0x677   :  { %v1116_v5 = vmul.f32 %v3340_v17, %v3338_v2  ;;  %v3342_v0 = vpop.eup %3341 }
 0x679   :  { %v1209_v21 = vpop.permute.xlu0 %1208  ;;  %2709 = vmatmul.mubr.msk.f32.vlgmr.msra.gmra.mrb[4].mxu1 %vm390_vm4, %v1116_v5 }
 0x67a   :  { %v4145_v22 = vadd.f32 %v1209_v21, %v1205_v19  ;;  %2972 = vmatpush1.bf16.msra.mxu1 %v3917_v62  ;;  %1355 = vmatprep.mubr.f32.mxu1 %v3626_v1 }
 0x67b   :  { %2974 = vmatprep.subr.bf16.mxu1 %v3924_v3 }
 0x67c   :  { %3343 = vtanh.f32 %v4145_v22 }
 0x67e   :  { %2976 = vmatpush1.bf16.msra.mxu1 %v3934_v9 }
 0x67f   :  { %2978 = vmatprep.subr.bf16.mxu1 %v3951_v18 }
 0x682   :  { %2980 = vmatpush1.bf16.msra.mxu1 %v3970_v29 }
 0x683   :  { %2982 = vmatprep.subr.bf16.mxu1 %v3979_v35 }
 0x686   :  { %v3344_v15 = vpop.eup %3343  ;;  %2984 = vmatpush1.bf16.msra.mxu1 %v3999_v52 }
 0x687   :  { %v1213_v27 = vmul.f32 %v3344_v15, %v3342_v0  ;;  %3002 = vmatprep.subr.bf16.mxu1 %v3831_v12 }
 0x689   :  { %2710 = vmatmul.mubr.msk.f32.vlgmr.msra.gmra.mrb[4].mxu1 %vm390_vm4, %v1213_v27  ;;  %2713 = vmatmul.mubr.msk.f32.vlgmr.msra.gmra.mrb[8].mxu0 %vm390_vm4, %v1213_v27 }
 0x68a   :  { %3004 = vmatpush1.bf16.msra.mxu1 %v3836_v16  ;;  %3036 = vmatpush1.bf16.msra.mxu0 %v3874_v37 }
 0x68b   :  { %3006 = vmatprep.subr.bf16.mxu1 %v3840_v20  ;;  %3038 = vmatprep.subr.bf16.mxu0 %v3932_v8 }
 0x68c   :  { %1550 = vmatprep.mubr.f32.mxu1 %v3626_v1  ;;  %1721 = vmatprep.mubr.f32.mxu0 %v3626_v1 }
 0x68e   :  { %3008 = vmatpush1.bf16.msra.mxu1 %v3847_v24  ;;  %3040 = vmatpush1.bf16.msra.mxu0 %v3944_v13 }
 0x68f   :  { %3010 = vmatprep.subr.bf16.mxu1 %v3850_v25  ;;  %3042 = vmatprep.subr.bf16.mxu0 %v3961_v23 }
 0x692   :  { %3012 = vmatpush1.bf16.msra.mxu1 %v3872_v36  ;;  %3044 = vmatpush1.bf16.msra.mxu0 %v3972_v30 }
 0x693   :  { %3014 = vmatprep.subr.bf16.mxu1 %v3877_v38  ;;  %3046 = vmatprep.subr.bf16.mxu0 %v3989_v42 }
 0x696   :  { %3016 = vmatpush1.bf16.msra.mxu1 %v3887_v44  ;;  %3048 = vmatpush1.bf16.msra.mxu0 %v4001_v53 }
 0x697   :  { %3018 = vmatprep.subr.bf16.mxu1 %v3890_v45  ;;  %3082 = vmatprep.subr.bf16.mxu0 %v3863_v33 }
 0x75c   :  { %v1357_v48 = vpop.f32.mrb[4].mxu1  ;;  %v1454_v28 = vpop.f32.mrb[8].mxu0 }
 0x75d   :  { %v1362_v31 = vadd.f32 %v1357_v48, %v4040_v7  ;;  %v3207_v32 = vadd.f32 %v1454_v28, %v3906_v50  ;;  %v1359_v34 = vpop.f32.mrb[5].mxu1  ;;  %v1456_v39 = vpop.f32.mrb[9].mxu0 }
 0x75e   :  { %v1363_v43 = vadd.f32 %v1359_v34, %v4046_v26  ;;  %v3208_v46 = vadd.f32 %v1456_v39, %v3912_v56 }
 0x75f   :  { %v2711_v40 = vmul.f32 -1.442695, %v1362_v31  ;;  %v2714_v41 = vmul.f32 -1.442695, %v3207_v32 }
 0x760   :  { %v2712_v6 = vmul.f32 -1.442695, %v1363_v43  ;;  %v2715_v57 = vmul.f32 -1.442695, %v3208_v46 }
 0x761   :  { %3345 = vpow2.f32 %v2711_v40 }
 0x762   :  { %3347 = vpow2.f32 %v2714_v41 }
 0x763   :  { %3349 = vtanh.f32 %v1363_v43 }
 0x764   :  { %3351 = vtanh.f32 %v3208_v46 }
 0x76b   :  { %v3346_v47 = vpop.eup %3345 }
 0x76c   :  { %v3348_v55 = vpop.eup %3347  ;;  %v1370_v49 = vadd.f32 1.0, %v3346_v47 }
 0x76d   :  { %v1467_v51 = vadd.f32 1.0, %v3348_v55  ;;  %v3350_v54 = vpop.eup %3349 }
 0x76e   :  { %3353 = vrcp.f32 %v1370_v49  ;;  %v3352_v58 = vpop.eup %3351 }
 0x76f   :  { %3355 = vrcp.f32 %v1467_v51 }
 0x770   :  { %3357 = vpow2.f32 %v2712_v6 }
 0x771   :  { %3359 = vpow2.f32 %v2715_v57 }
 0x778   :  { %v3354_v59 = vpop.eup %3353 }
 0x779   :  { %v3356_v60 = vpop.eup %3355  ;;  %v1378_v61 = vmul.f32 %v3354_v59, %v3350_v54  ;;  %v1377_v4 = vmul.f32 %v3354_v59, %v4140_v11 }
 0x77a   :  { %v1475_v63 = vmul.f32 %v3356_v60, %v3352_v58  ;;  %v3358_v10 = vpop.eup %3357  ;;  %v1474_v5 = vmul.f32 %v3356_v60, %v4145_v22 }
 0x77b   :  { %1380 = vrot.lane.b32.xlu1 %v1378_v61, %s3628_s3  ;;  %v3360_v14 = vpop.eup %3359  ;;  %v1371_v2 = vadd.f32 1.0, %v3358_v10 }
 0x77c   :  { %1477 = vrot.lane.b32.xlu0 %v1475_v63, %s3628_s3  ;;  %v1468_v17 = vadd.f32 1.0, %v3360_v14 }
 0x77d   :  { %3361 = vrcp.f32 %v1371_v2 }
 0x77e   :  { %3363 = vrcp.f32 %v1468_v17 }
 0x787   :  { %v3362_v27 = vpop.eup %3361 }
 0x788   :  { %v3364_v48 = vpop.eup %3363 }
 0x7ed   :  { %v1381_v19 = vpop.permute.xlu1 %1380 }
 0x7ee   :  { %v1478_v21 = vpop.permute.xlu0 %1477  ;;  %v4185_v0 = vadd.f32 %v1381_v19, %v1377_v4 }
 0x7ef   :  { %v4187_v15 = vadd.f32 %v1478_v21, %v1474_v5 }
 0x7f0   :  { %3365 = vtanh.f32 %v4185_v0 }
 0x7f1   :  { %3367 = vtanh.f32 %v4187_v15 }
 0x7fa   :  { %v3366_v28 = vpop.eup %3365 }
 0x7fb   :  { %v3368_v31 = vpop.eup %3367  ;;  %v1385_v32 = vmul.f32 %v3366_v28, %v3362_v27 }
 0x7fc   :  { %v1482_v11 = vmul.f32 %v3368_v31, %v3364_v48 }
 0x7fd   :  { %2716 = vmatmul.mubr.msk.f32.vlgmr.msra.gmra.mrb[6].mxu1 %vm390_vm4, %v1385_v32 }
 0x7fe   :  { %3020 = vmatpush1.bf16.msra.mxu1 %v3917_v62  ;;  %2720 = vmatmul.mubr.msk.f32.vlgmr.msra.gmra.mrb[10].mxu0 %vm390_vm4, %v1482_v11 }
 0x7ff   :  { %3022 = vmatprep.subr.bf16.mxu1 %v3924_v3  ;;  %1624 = vmatprep.mubr.f32.mxu1 %v3626_v1 }
 0x800   :  { %3084 = vmatpush1.bf16.msra.mxu0 %v3874_v37  ;;  %1990 = vmatprep.mubr.f32.mxu0 %v3626_v1 }
 0x801   :  { %3086 = vmatprep.subr.bf16.mxu0 %v3932_v8 }
 0x802   :  { %3024 = vmatpush1.bf16.msra.mxu1 %v3934_v9 }
 0x803   :  { %3026 = vmatprep.subr.bf16.mxu1 %v3951_v18 }
 0x804   :  { %3088 = vmatpush1.bf16.msra.mxu0 %v3944_v13 }
 0x805   :  { %3090 = vmatprep.subr.bf16.mxu0 %v3961_v23 }
 0x806   :  { %3028 = vmatpush1.bf16.msra.mxu1 %v3970_v29 }
 0x807   :  { %3030 = vmatprep.subr.bf16.mxu1 %v3979_v35 }
 0x808   :  { %3092 = vmatpush1.bf16.msra.mxu0 %v3972_v30 }
 0x809   :  { %3094 = vmatprep.subr.bf16.mxu0 %v3989_v42 }
 0x80a   :  { %3032 = vmatpush1.bf16.msra.mxu1 %v3999_v52 }
 0x80b   :  { %3050 = vmatprep.subr.bf16.mxu1 %v3831_v12 }
 0x80c   :  { %3096 = vmatpush1.bf16.msra.mxu0 %v4001_v53 }
 0x80d   :  { %2717 = vmatmul.mubr.msk.f32.vlgmr.msra.gmra.mrb[6].mxu1 %vm390_vm4, %v1482_v11  ;;  %3098 = vmatprep.subr.bf16.mxu0 %v3831_v12 }
 0x80e   :  { %3052 = vmatpush1.bf16.msra.mxu1 %v3836_v16  ;;  %1819 = vmatprep.mubr.f32.mxu1 %v3626_v1 }
 0x80f   :  { %3054 = vmatprep.subr.bf16.mxu1 %v3840_v20 }
 0x812   :  { %3056 = vmatpush1.bf16.msra.mxu1 %v3847_v24 }
 0x813   :  { %3058 = vmatprep.subr.bf16.mxu1 %v3850_v25 }
 0x816   :  { %3060 = vmatpush1.bf16.msra.mxu1 %v3872_v36 }
 0x817   :  { %3062 = vmatprep.subr.bf16.mxu1 %v3877_v38 }
 0x81a   :  { %3064 = vmatpush1.bf16.msra.mxu1 %v3887_v44 }
 0x81b   :  { %3066 = vmatprep.subr.bf16.mxu1 %v3890_v45 }
 0x8d1   :  { %v1723_v22 = vpop.f32.mrb[10].mxu0 }
 0x8d2   :  { %v3209_v34 = vadd.f32 %v1723_v22, %v3906_v50  ;;  %v1725_v39 = vpop.f32.mrb[11].mxu0 }
 0x8d3   :  { %v3210_v41 = vadd.f32 %v1725_v39, %v3912_v56 }
 0x8d4   :  { %v2721_v40 = vmul.f32 -1.442695, %v3209_v34 }
 0x8d5   :  { %v2722_v14 = vmul.f32 -1.442695, %v3210_v41 }
 0x8d6   :  { %3369 = vpow2.f32 %v2721_v40 }
 0x8d7   :  { %3371 = vtanh.f32 %v3210_v41 }
 0x8e0   :  { %v3370_v43 = vpop.eup %3369  ;;  %v1626_v46 = vpop.f32.mrb[6].mxu1 }
 0x8e1   :  { %v1736_v47 = vadd.f32 1.0, %v3370_v43  ;;  %v1631_v55 = vadd.f32 %v1626_v46, %v4040_v7  ;;  %v1628_v49 = vpop.f32.mrb[7].mxu1  ;;  %v3372_v54 = vpop.eup %3371 }
 0x8e2   :  { %v1632_v59 = vadd.f32 %v1628_v49, %v4046_v26 }
 0x8e3   :  { %3373 = vrcp.f32 %v1736_v47  ;;  %v2718_v51 = vmul.f32 -1.442695, %v1631_v55 }
 0x8e4   :  { %v2719_v17 = vmul.f32 -1.442695, %v1632_v59 }
 0x8e5   :  { %3375 = vpow2.f32 %v2718_v51 }
 0x8e6   :  { %3377 = vtanh.f32 %v1632_v59 }
 0x8ed   :  { %v3374_v58 = vpop.eup %3373 }
 0x8ee   :  { %v1744_v60 = vmul.f32 %v3374_v58, %v3372_v54  ;;  %v1743_v5 = vmul.f32 %v3374_v58, %v4187_v15 }
 0x8ef   :  { %v3376_v61 = vpop.eup %3375 }
 0x8f0   :  { %v1639_v63 = vadd.f32 1.0, %v3376_v61  ;;  %1746 = vrot.lane.b32.xlu0 %v1744_v60, %s3628_s3  ;;  %v3378_v6 = vpop.eup %3377 }
 0x8f2   :  { %3379 = vrcp.f32 %v1639_v63 }
 0x8f3   :  { %3381 = vpow2.f32 %v2722_v14 }
 0x8f4   :  { %3383 = vpow2.f32 %v2719_v17 }
 0x8fc   :  { %v3380_v57 = vpop.eup %3379 }
 0x8fd   :  { %v1647_v10 = vmul.f32 %v3380_v57, %v3378_v6  ;;  %v3382_v2 = vpop.eup %3381  ;;  %v1646_v32 = vmul.f32 %v3380_v57, %v4185_v0 }
 0x8fe   :  { %v1737_v4 = vadd.f32 1.0, %v3382_v2  ;;  %v3384_v27 = vpop.eup %3383 }
 0x8ff   :  { %1649 = vrot.lane.b32.xlu1 %v1647_v10, %s3628_s3  ;;  %v1640_v31 = vadd.f32 1.0, %v3384_v27 }
 0x900   :  { %3385 = vrcp.f32 %v1737_v4 }
 0x90a   :  { %v3386_v48 = vpop.eup %3385 }
 0x962   :  { %v1747_v19 = vpop.permute.xlu0 %1746 }
 0x963   :  { %v4228_v21 = vadd.f32 %v1747_v19, %v1743_v5 }
 0x965   :  { %3387 = vtanh.f32 %v4228_v21 }
 0x966   :  { %3389 = vrcp.f32 %v1640_v31 }
 0x96f   :  { %v3388_v28 = vpop.eup %3387 }
 0x970   :  { %v1751_v11 = vmul.f32 %v3388_v28, %v3386_v48  ;;  %v3390_v0 = vpop.eup %3389 }
 0x971   :  { %v1650_v22 = vpop.permute.xlu1 %1649 }
 0x972   :  { %v4232_v34 = vadd.f32 %v1650_v22, %v1646_v32  ;;  %2727 = vmatmul.mubr.msk.f32.vlgmr.msra.gmra.mrb[12].mxu0 %vm390_vm4, %v1751_v11 }
 0x973   :  { %3100 = vmatpush1.bf16.msra.mxu0 %v3836_v16  ;;  %2088 = vmatprep.mubr.f32.mxu0 %v3626_v1 }
 0x974   :  { %3391 = vtanh.f32 %v4232_v34  ;;  %3102 = vmatprep.subr.bf16.mxu0 %v3840_v20 }
 0x977   :  { %3104 = vmatpush1.bf16.msra.mxu0 %v3847_v24 }
 0x978   :  { %3106 = vmatprep.subr.bf16.mxu0 %v3850_v25 }
 0x97b   :  { %3108 = vmatpush1.bf16.msra.mxu0 %v3872_v36 }
 0x97c   :  { %3110 = vmatprep.subr.bf16.mxu0 %v3877_v38 }
 0x97e   :  { %v3392_v15 = vpop.eup %3391 }
 0x97f   :  { %v1654_v39 = vmul.f32 %v3392_v15, %v3390_v0  ;;  %3112 = vmatpush1.bf16.msra.mxu0 %v3887_v44 }
 0x980   :  { %3114 = vmatprep.subr.bf16.mxu0 %v3890_v45 }
 0x981   :  { %2723 = vmatmul.mubr.msk.f32.vlgmr.msra.gmra.mrb[8].mxu1 %vm390_vm4, %v1654_v39 }
 0x982   :  { %3068 = vmatpush1.bf16.msra.mxu1 %v3917_v62  ;;  %1893 = vmatprep.mubr.f32.mxu1 %v3626_v1 }
 0x983   :  { %3070 = vmatprep.subr.bf16.mxu1 %v3924_v3 }
 0x986   :  { %3072 = vmatpush1.bf16.msra.mxu1 %v3934_v9 }
 0x987   :  { %3074 = vmatprep.subr.bf16.mxu1 %v3951_v18 }
 0x98a   :  { %3076 = vmatpush1.bf16.msra.mxu1 %v3970_v29 }
 0x98b   :  { %3078 = vmatprep.subr.bf16.mxu1 %v3979_v35 }
 0x98e   :  { %3080 = vmatpush1.bf16.msra.mxu1 %v3999_v52 }
 0x98f   :  { %3146 = vmatprep.subr.bf16.mxu1 %v3831_v12 }
 0x991   :  { %2724 = vmatmul.mubr.msk.f32.vlgmr.msra.gmra.mrb[8].mxu1 %vm390_vm4, %v1751_v11 }
 0x992   :  { %3148 = vmatpush1.bf16.msra.mxu1 %v3836_v16  ;;  %2357 = vmatprep.mubr.f32.mxu1 %v3626_v1 }
 0x993   :  { %3150 = vmatprep.subr.bf16.mxu1 %v3840_v20 }
 0x996   :  { %3152 = vmatpush1.bf16.msra.mxu1 %v3847_v24 }
 0x997   :  { %3154 = vmatprep.subr.bf16.mxu1 %v3850_v25 }
 0x99a   :  { %3156 = vmatpush1.bf16.msra.mxu1 %v3872_v36 }
 0x99b   :  { %3158 = vmatprep.subr.bf16.mxu1 %v3877_v38 }
 0x99e   :  { %3160 = vmatpush1.bf16.msra.mxu1 %v3887_v44 }
 0x99f   :  { %3162 = vmatprep.subr.bf16.mxu1 %v3890_v45 }
 0xa45   :  { %v1992_v12 = vpop.f32.mrb[12].mxu0 }
 0xa46   :  { %v3211_v40 = vadd.f32 %v1992_v12, %v3906_v50  ;;  %v1994_v16 = vpop.f32.mrb[13].mxu0 }
 0xa47   :  { %v3212_v20 = vadd.f32 %v1994_v16, %v3912_v56 }
 0xa48   :  { %v2728_v41 = vmul.f32 -1.442695, %v3211_v40 }
 0xa49   :  { %v2729_v63 = vmul.f32 -1.442695, %v3212_v20 }
 0xa4a   :  { %3393 = vpow2.f32 %v2728_v41 }
 0xa4b   :  { %3395 = vtanh.f32 %v3212_v20 }
 0xa54   :  { %v3394_v43 = vpop.eup %3393 }
 0xa55   :  { %v2005_v24 = vadd.f32 1.0, %v3394_v43  ;;  %v3396_v25 = vpop.eup %3395 }
 0xa57   :  { %3397 = vrcp.f32 %v2005_v24 }
 0xa61   :  { %v3398_v36 = vpop.eup %3397 }
 0xa62   :  { %v2013_v46 = vmul.f32 %v3398_v36, %v3396_v25  ;;  %v2012_v4 = vmul.f32 %v3398_v36, %v4228_v21 }
 0xa64   :  { %v1895_v38 = vpop.f32.mrb[8].mxu1  ;;  %2015 = vrot.lane.b32.xlu0 %v2013_v46, %s3628_s3 }
 0xa65   :  { %v1900_v44 = vadd.f32 %v1895_v38, %v4040_v7  ;;  %v1897_v45 = vpop.f32.mrb[9].mxu1 }
 0xa66   :  { %v1901_v55 = vadd.f32 %v1897_v45, %v4046_v26 }
 0xa67   :  { %v2725_v47 = vmul.f32 -1.442695, %v1900_v44 }
 0xa68   :  { %v2726_v60 = vmul.f32 -1.442695, %v1901_v55 }
 0xa69   :  { %3399 = vpow2.f32 %v2725_v47 }
 0xa6a   :  { %3401 = vtanh.f32 %v1901_v55 }
 0xa73   :  { %v3400_v49 = vpop.eup %3399 }
 0xa74   :  { %v1908_v51 = vadd.f32 1.0, %v3400_v49  ;;  %v3402_v54 = vpop.eup %3401 }
 0xa76   :  { %3403 = vrcp.f32 %v1908_v51 }
 0xa77   :  { %3405 = vpow2.f32 %v2726_v60 }
 0xa78   :  { %3407 = vpow2.f32 %v2729_v63 }
 0xa80   :  { %v3404_v58 = vpop.eup %3403 }
 0xa81   :  { %v1916_v59 = vmul.f32 %v3404_v58, %v3402_v54  ;;  %v3406_v61 = vpop.eup %3405  ;;  %v1915_v57 = vmul.f32 %v3404_v58, %v4232_v34 }
 0xa82   :  { %v1909_v6 = vadd.f32 1.0, %v3406_v61  ;;  %v3408_v17 = vpop.eup %3407 }
 0xa83   :  { %1918 = vrot.lane.b32.xlu1 %v1916_v59, %s3628_s3  ;;  %v2006_v28 = vadd.f32 1.0, %v3408_v17 }
 0xa84   :  { %3409 = vrcp.f32 %v1909_v6 }
 0xa8e   :  { %v3410_v5 = vpop.eup %3409 }
 0xad6   :  { %v2016_v2 = vpop.permute.xlu0 %2015 }
 0xad7   :  { %v4276_v27 = vadd.f32 %v2016_v2, %v2012_v4  ;;  %v2465_v2 = vld [vmem:[#allocation9 + $0x18] sm:$0xff]  ;;  %v2466_v4 = vld [vmem:[#allocation9 + $0x20] sm:$0xff] }
 0xaf5   :  { %v1919_v10 = vpop.permute.xlu1 %1918 }
 0xaf6   :  { %v4272_v14 = vadd.f32 %v1919_v10, %v1915_v57  ;;  %v2462_v57 = vld [vmem:[#allocation9] sm:$0xff]  ;;  %v2463_v10 = vld [vmem:[#allocation9 + $0x8] sm:$0xff] }
 0xaf8   :  { %3411 = vtanh.f32 %v4272_v14 }
 0xaf9   :  { %3413 = vtanh.f32 %v4276_v27 }
 0xafa   :  { %3415 = vrcp.f32 %v2006_v28 }
 0xb02   :  { %v3412_v19 = vpop.eup %3411 }
 0xb03   :  { %v1923_v48 = vmul.f32 %v3412_v19, %v3410_v5  ;;  %v3414_v21 = vpop.eup %3413  ;;  %v2467_v5 = vld [vmem:[#allocation9 + $0x28] sm:$0xff]  ;;  %v2469_v19 = vld [vmem:[#allocation9 + $0x38] sm:$0xff] }
 0xb04   :  { %v3416_v31 = vpop.eup %3415 }
 0xb05   :  { %2730 = vmatmul.mubr.msk.f32.vlgmr.msra.gmra.mrb[18].mxu0 %vm390_vm4, %v1923_v48  ;;  %v2020_v32 = vmul.f32 %v3416_v31, %v3414_v21  ;;  %v2553_v31 = vld [vmem:[#allocation11] sm:$0xff] }
 0xb06   :  { %3116 = vmatpush1.bf16.msra.mxu0 %v3917_v62  ;;  %2162 = vmatprep.mubr.f32.mxu0 %v3626_v1 }
 0xb07   :  { %3118 = vmatprep.subr.bf16.mxu0 %v3924_v3 }
 0xb0a   :  { %3120 = vmatpush1.bf16.msra.mxu0 %v3934_v9 }
 0xb0b   :  { %3122 = vmatprep.subr.bf16.mxu0 %v3951_v18 }
 0xb0e   :  { %3124 = vmatpush1.bf16.msra.mxu0 %v3970_v29 }
 0xb0f   :  { %3126 = vmatprep.subr.bf16.mxu0 %v3979_v35 }
 0xb12   :  { %3128 = vmatpush1.bf16.msra.mxu0 %v3999_v52 }
 0xb13   :  { %3130 = vmatprep.subr.bf16.mxu0 %v3863_v33 }
 0xb15   :  { %2731 = vmatmul.mubr.msk.f32.vlgmr.msra.gmra.mrb[18].mxu0 %vm390_vm4, %v2020_v32 }
 0xb16   :  { %3132 = vmatpush1.bf16.msra.mxu0 %v3874_v37  ;;  %2259 = vmatprep.mubr.f32.mxu0 %v3626_v1 }
 0xb17   :  { %3134 = vmatprep.subr.bf16.mxu0 %v3932_v8 }
 0xb1a   :  { %3136 = vmatpush1.bf16.msra.mxu0 %v3944_v13 }
 0xb1b   :  { %3138 = vmatprep.subr.bf16.mxu0 %v3961_v23 }
 0xb1e   :  { %3140 = vmatpush1.bf16.msra.mxu0 %v3972_v30 }
 0xb1f   :  { %3142 = vmatprep.subr.bf16.mxu0 %v3989_v42 }
 0xb22   :  { %3144 = vmatpush1.bf16.msra.mxu0 %v4001_v53 }
 0xb25   :  { %2734 = vmatmul.mubr.msk.f32.vlgmr.msra.gmra.mrb[14].mxu0 %vm390_vm4, %v2020_v32  ;;  %v2554_v32 = vld [vmem:[#allocation11 + $0x8] sm:$0xff] }
 0xb26   :  { %2800 = vmatprep.mubr.msk.f32.mxu0 %vm3630_vm5, %v3626_v1 }
 0xbe8   :  { %v2164_v33 = vpop.f32.mrb[18].mxu0 }
 0xbe9   :  { %v2169_v11 = vadd.f32 %v2164_v33, %v4040_v7  ;;  %v2166_v37 = vpop.f32.mrb[19].mxu0  ;;  %v2555_v33 = vld [vmem:[#allocation11 + $0x10] sm:$0xff] }
 0xbea   :  { %v2170_v8 = vadd.f32 %v2166_v37, %v4046_v26  ;;  %v2556_v37 = vld [vmem:[#allocation11 + $0x18] sm:$0xff] }
 0xbeb   :  { %v2732_v22 = vmul.f32 -1.442695, %v2169_v11  ;;  %v3190_v11 = vpack.c.bf16 %v2554_v32, %v2553_v31 }
 0xbed   :  { %3417 = vpow2.f32 %v2732_v22  ;;  %v2557_v22 = vld [vmem:[#allocation11 + $0x20] sm:$0xff] }
 0xbee   :  { %3419 = vtanh.f32 %v2170_v8 }
 0xbf7   :  { %v3418_v34 = vpop.eup %3417 }
 0xbf8   :  { %v2177_v13 = vadd.f32 1.0, %v3418_v34  ;;  %v2261_v0 = vpop.f32.mrb[14].mxu0  ;;  %v3420_v53 = vpop.eup %3419 }
 0xbf9   :  { %v3213_v23 = vadd.f32 %v2261_v0, %v3906_v50  ;;  %v2263_v30 = vpop.f32.mrb[15].mxu0  ;;  %v2733_v50 = vmul.f32 -1.442695, %v2170_v8  ;;  %v2558_v8 = vld [vmem:[#allocation11 + $0x28] sm:$0xff] }
 0xbfa   :  { %3421 = vrcp.f32 %v2177_v13  ;;  %v3214_v39 = vadd.f32 %v2263_v30, %v3912_v56  ;;  %v3196_v34 = vpack.c.bf16 %v2558_v8, %v2557_v22 }
 0xbfb   :  { %v2735_v42 = vmul.f32 -1.442695, %v3213_v23 }
 0xbfc   :  { %v2736_v25 = vmul.f32 -1.442695, %v3214_v39 }
 0xbfd   :  { %3423 = vpow2.f32 %v2735_v42 }
 0xbfe   :  { %3425 = vtanh.f32 %v3214_v39 }
 0xc04   :  { %v3422_v15 = vpop.eup %3421 }
 0xc05   :  { %v2185_v12 = vmul.f32 %v3422_v15, %v3420_v53  ;;  %v2184_v46 = vmul.f32 %v3422_v15, %v4272_v14  ;;  %v2464_v14 = vld [vmem:[#allocation9 + $0x10] sm:$0xff] }
 0xc06   :  { %v3181_v17 = vpack.c.bf16 %v2465_v2, %v2464_v14 }
 0xc07   :  { %v3424_v40 = vpop.eup %3423  ;;  %2187 = vrot.lane.b32.xlu1 %v2185_v12, %s3628_s3 }
 0xc08   :  { %v2274_v16 = vadd.f32 1.0, %v3424_v40  ;;  %v3426_v41 = vpop.eup %3425  ;;  %v2559_v40 = vld [vmem:[#allocation11 + $0x30] sm:$0xff] }
 0xc0a   :  { %3427 = vrcp.f32 %v2274_v16  ;;  %v2560_v16 = vld [vmem:[#allocation11 + $0x38] sm:$0xff] }
 0xc0b   :  { %3429 = vpow2.f32 %v2733_v50 }
 0xc0c   :  { %3431 = vpow2.f32 %v2736_v25 }
 0xc14   :  { %v3428_v20 = vpop.eup %3427 }
 0xc15   :  { %v2282_v43 = vmul.f32 %v3428_v20, %v3426_v41  ;;  %v3430_v24 = vpop.eup %3429  ;;  %v2281_v51 = vmul.f32 %v3428_v20, %v4276_v27  ;;  %v3199_v41 = vpack.c.bf16 %v2560_v16, %v2559_v40  ;;  %v2741_v20 = vld [vmem:[%s4343_s8] ss:$0 sm:$0xff] }
 0xc16   :  { %v2178_v36 = vadd.f32 1.0, %v3430_v24  ;;  %v3432_v44 = vpop.eup %3431 }
 0xc17   :  { %2284 = vrot.lane.b32.xlu0 %v2282_v43, %s3628_s3  ;;  %v2275_v55 = vadd.f32 1.0, %v3432_v44 }
 0xc18   :  { %3433 = vrcp.f32 %v2178_v36 }
 0xc22   :  { %v3434_v45 = vpop.eup %3433 }
 0xc79   :  { %v2188_v56 = vpop.permute.xlu1 %2187 }
 0xc7a   :  { %v4306_v38 = vadd.f32 %v2188_v56, %v2184_v46  ;;  %v2743_v46 = vld [vmem:[#allocation12] ss:$0 sm:$0xff] }
 0xc7c   :  { %3435 = vtanh.f32 %v4306_v38 }
 0xc7d   :  { %3437 = vrcp.f32 %v2275_v55  ;;  %v2745_v55 = vld [vmem:[#allocation14] ss:$0 sm:$0xff] }
 0xc86   :  { %v3436_v47 = vpop.eup %3435 }
 0xc87   :  { %v2192_v49 = vmul.f32 %v3436_v47, %v3434_v45  ;;  %v3438_v59 = vpop.eup %3437 }
 0xc89   :  { %v2285_v54 = vpop.permute.xlu0 %2284  ;;  %2737 = vmatmul.mubr.msk.f32.vlgmr.msra.gmra.mrb[10].mxu1 %vm390_vm4, %v2192_v49 }
 0xc8a   :  { %v2287_v58 = vadd.f32 %v2285_v54, %v2281_v51  ;;  %3164 = vmatpush1.bf16.msra.mxu1 %v3917_v62  ;;  %2431 = vmatprep.mubr.f32.mxu1 %v3626_v1  ;;  %v3629_v62 = vmov 0.0|0.0  }
 0xc8b   :  { %3166 = vmatprep.subr.bf16.mxu1 %v3924_v3  ;;  %3189 = vmatprep.subr.bf16.mxu0 %v3629_v62 }
 0xc8c   :  { %3439 = vtanh.f32 %v2287_v58  ;;  %3191 = vmatpush3.bf16.msra.mxu0 %v3190_v11  ;;  %v2746_v58 = vld [vmem:[#allocation3] ss:$0 sm:$0xff] }
 0xc8d   :  { %3192 = vmatprep.subr.bf16.mxu0 %v3629_v62 }
 0xc8e   :  { %3168 = vmatpush1.bf16.msra.mxu1 %v3934_v9 }
 0xc8f   :  { %3170 = vmatprep.subr.bf16.mxu1 %v3951_v18 }
 0xc92   :  { %3172 = vmatpush1.bf16.msra.mxu1 %v3970_v29 }
 0xc93   :  { %3174 = vmatprep.subr.bf16.mxu1 %v3979_v35 }
 0xc96   :  { %v3440_v60 = vpop.eup %3439  ;;  %3176 = vmatpush1.bf16.msra.mxu1 %v3999_v52  ;;  %v3178_v52 = vpack.c.bf16 %v2463_v10, %v2462_v57 }
 0xc97   :  { %v2289_v61 = vmul.f32 %v3440_v60, %v3438_v59  ;;  %3177 = vmatprep.subr.bf16.mxu1 %v3629_v62 }
 0xc99   :  { %2738 = vmatmul.mubr.msk.f32.vlgmr.msra.gmra.mrb[10].mxu1 %vm390_vm4, %v2289_v61 }
 0xc9a   :  { %3179 = vmatpush3.bf16.msra.mxu1 %v3178_v52  ;;  %2781 = vmatprep.mubr.msk.f32.mxu1 %vm3630_vm5, %v3626_v1  ;;  %v3193_v1 = vpack.c.bf16 %v2556_v37, %v2555_v33 }
 0xc9b   :  { %3180 = vmatprep.subr.bf16.mxu1 %v3629_v62 }
 0xc9c   :  { %3194 = vmatpush3.bf16.msra.mxu0 %v3193_v1 }
 0xc9d   :  { %3195 = vmatprep.subr.bf16.mxu0 %v3629_v62 }
 0xc9e   :  { %3182 = vmatpush3.bf16.msra.mxu1 %v3181_v17 }
 0xc9f   :  { %3183 = vmatprep.subr.bf16.mxu1 %v3629_v62 }
 0xca0   :  { %3197 = vmatpush3.bf16.msra.mxu0 %v3196_v34 }
 0xca1   :  { %3198 = vmatprep.subr.bf16.mxu0 %v3629_v62 }
 0xca4   :  { %3200 = vmatpush3.bf16.msra.mxu0 %v3199_v41 }
 0xd6c   :  { %v2433_v3 = vpop.f32.mrb[10].mxu1 }
 0xd6d   :  { %v2438_v63 = vadd.f32 %v2433_v3, %v4040_v7  ;;  %v2435_v9 = vpop.f32.mrb[11].mxu1  ;;  %v3184_v7 = vpack.c.bf16 %v2467_v5, %v2466_v4 }
 0xd6e   :  { %v2439_v18 = vadd.f32 %v2435_v9, %v4046_v26  ;;  %v2468_v26 = vld [vmem:[#allocation9 + $0x30] sm:$0xff] }
 0xd6f   :  { %v2739_v6 = vmul.f32 -1.442695, %v2438_v63  ;;  %3185 = vmatpush3.bf16.msra.mxu1 %v3184_v7  ;;  %v3187_v28 = vpack.c.bf16 %v2469_v19, %v2468_v26 }
 0xd70   :  { %3186 = vmatprep.subr.bf16.mxu1 %v3629_v62  ;;  %v2740_v13 = vmul.f32 -1.442695, %v2439_v18 }
 0xd71   :  { %3441 = vpow2.f32 %v2739_v6 }
 0xd72   :  { %3443 = vtanh.f32 %v2439_v18 }
 0xd73   :  { %3188 = vmatpush3.bf16.msra.mxu1 %v3187_v28 }
 0xd7b   :  { %v3442_v29 = vpop.eup %3441 }
 0xd7c   :  { %v2446_v35 = vadd.f32 1.0, %v3442_v29  ;;  %v3444_v27 = vpop.eup %3443 }
 0xd7e   :  { %3445 = vrcp.f32 %v2446_v35 }
 0xd7f   :  { %3447 = vpow2.f32 %v2740_v13 }
 0xd88   :  { %v3446_v48 = vpop.eup %3445 }
 0xd89   :  { %v2454_v21 = vmul.f32 %v3446_v48, %v3444_v27  ;;  %v3448_v0 = vpop.eup %3447  ;;  %v2453_v30 = vmul.f32 %v3446_v48, %v4306_v38 }
 0xd8a   :  { %v2447_v23 = vadd.f32 1.0, %v3448_v0 }
 0xd8b   :  { %2456 = vrot.lane.b32.xlu1 %v2454_v21, %s3628_s3 }
 0xd8c   :  { %3449 = vrcp.f32 %v2447_v23 }
 0xd96   :  { %v3450_v15 = vpop.eup %3449 }
 0xdfd   :  { %v2457_v42 = vpop.permute.xlu1 %2456 }
 0xdfe   :  { %v2459_v53 = vadd.f32 %v2457_v42, %v2453_v30 }
 0xe00   :  { %3451 = vtanh.f32 %v2459_v53 }
 0xe0a   :  { %v3452_v39 = vpop.eup %3451 }
 0xe0b   :  { %v2461_v12 = vmul.f32 %v3452_v39, %v3450_v15 }
 0xe0d   :  { %2782 = vmatmul.mubr.msk.f32.vlgmr.msra.gmra.mrb[12].mxu1 %vm390_vm4, %v2461_v12 }
 0xee0   :  { %v2546_v43 = vpop.f32.mrb[12].mxu1 }
 0xee1   :  { %v2547_v50 = vadd.f32 %v2741_v20, %v2546_v43  ;;  %v2783_v24 = vpop.f32.mrb[13].mxu1 }
 0xee3   :  { %vm2550_vm6 = vcmp.gt.f32.partialorder %v2547_v50, 0.0  ;;  %v2551_v25 = vmul.f32 0.01, %v2547_v50 }
 0xee5   :  { %v2552_v36 = vsel %vm2550_vm6, %v2547_v50, %v2551_v25 }
 0xee6   :  { %2801 = vmatmul.mubr.msk.f32.vlgmr.msra.gmra.mrb[20].mxu0 %vm390_vm4, %v2552_v36 }
 0xfb9   :  { %v2637_v56 = vpop.f32.mrb[20].mxu0 }
 0xfba   :  { %v2638_v38 = vadd.f32 %v2743_v46, %v2637_v56  ;;  %v2802_v44 = vpop.f32.mrb[21].mxu0 }
 0xfbc   :  { %vm2641_vm7 = vcmp.gt.f32.partialorder %v2638_v38, 0.0  ;;  %v2642_v45 = vmul.f32 0.01, %v2638_v38 }
 0xfbe   :  { %v2643_v47 = vsel %vm2641_vm7, %v2638_v38, %v2642_v45 }
 0xfbf   :  { %v2644_v49 = vadd.f32 %v2643_v47, %v2461_v12 }
 0xfc1   :  { %v2652_v51 = vmul.f32 %v2745_v55, %v2644_v49 }
 0xfc3   :  { %v2653_v54 = vsel %vm390_vm4, %v2652_v51, 0.0 }
 0xfc4   :  { %2654 = vadd.xlane.f32.xlu0 %v2653_v54 }
0x1051   :  { %v2655_v59 = vpop.xlane.xlu0 %2654 }
0x1052   :  { %v2663_v60 = vadd.f32 %v2746_v58, %v2655_v59 }
0x1054   :  { %vm2664_vm9 = vcmp.gt.f32.partialorder %v2663_v60, 0.0  ;;  %v2665_v61 = vmul.f32 0.01, %v2663_v60 }
0x1056   :  { %v2666_v62 = vsel %vm2664_vm9, %v2663_v60, %v2665_v61 }
0x1057   :  { %2668 = vst.msk [vmem:[%s4348_s13] sm:$0xff] %vm2667_vm8, %v2666_v62 }
0x1058   :  { %2673 = vsyncpa [#allocation5], 1 }
0x1059   :  { %2674 = vsyncpa [#allocation7], 1 }
0x105a   :  { %2675 = vsyncpa [#allocation10], 1 }
0x105b   :  { %2676 = vsyncpa [#allocation13], 1 }

</bundles_post_ra>
